<compile_context>
chip_gen: v7x
topology: tpu7x:2x2x1
jax: 0.10.0
libtpu: 0.0.40
codegen_flags: <defaults>
</compile_context>

<pallas_src>
import jax
import jax.numpy as jnp
from jax.experimental import pallas as pl
from jax.experimental.pallas import tpu as pltpu

# Problem sizes: ResBlock(kernel_num=C, kernel_size=KS) on NCL input (B, C, L).
B, C, L, KS = 2, 128, 16, 9        # ConvEncoder uses ResBlock(kernel_num, 9)
PAD = KS // 2                      # Conv1d padding
P = KS // 2                        # MaxPool1d(kernel_size // 2); stride defaults to the window
L_OUT = (L - P) // P + 1
EPS = 1e-6                         # matches the module's custom LayerNorm default (eps=1e-06)
R = B * L                          # batch*length rows stacked on the sublane axis


def resblock_kernel(x_ref, w1_ref, b1_ref, g1_ref, be1_ref,
                    w2_ref, b2_ref, g2_ref, be2_ref, o_ref):
    # --- NCL -> channels-last rows, entirely in registers: (B*L, C) -------------------
    x = x_ref[...].astype(jnp.float32)                             # (B, C, L)
    h0 = jnp.concatenate([x[b].T for b in range(B)], axis=0)       # (B*L, C)

    # within-batch row index, used to mask the circular shifts below
    local = jnp.concatenate(
        [jax.lax.broadcasted_iota(jnp.int32, (L, C), 0)] * B, axis=0)   # (B*L, C)

    def conv_ln_relu(h, w_flat, b, g, be):
        # Conv1d(C, C, KS, padding=PAD): build the KS shifted row views with cheap XLU
        # rolls + masks (no VMEM pad scratch), lane-concatenate them (128-aligned pieces)
        # and run ONE (B*L, KS*C) x (KS*C, C) matmul on the MXU.
        taps = []
        for k in range(KS):
            shift = (PAD - k) % R
            shifted = h if shift == 0 else pltpu.roll(h, shift=shift, axis=0)
            valid = (local >= PAD - k) & (local < L + PAD - k)     # zero padding region
            taps.append(jnp.where(valid, shifted, 0.0))
        stacked = jnp.concatenate(taps, axis=-1)                   # (B*L, KS*C)
        y = jnp.dot(stacked, w_flat, preferred_element_type=jnp.float32) + b

        # channels-first LayerNorm (module's custom LayerNorm) == normalize over lanes here
        u = jnp.mean(y, axis=-1, keepdims=True)
        v = jnp.mean((y - u) ** 2, axis=-1, keepdims=True)
        y = (y - u) * jax.lax.rsqrt(v + EPS)                       # EUP rsqrt (free slot)
        y = g * y + be
        return jnp.maximum(y, 0.0)                                 # ReLU

    h = conv_ln_relu(h0, w1_ref[...], b1_ref[...], g1_ref[...], be1_ref[...])
    h = conv_ln_relu(h, w2_ref[...], b2_ref[...], g2_ref[...], be2_ref[...])
    z = h + h0                                                     # residual add

    # MaxPool1d(P) (window P, stride P, no padding) + channels-last -> NCL, one store.
    outs = []
    for b in range(B):
        zb = z[b * L:(b + 1) * L, :]                               # (L, C), aligned slice
        pooled = jnp.max(zb.reshape(L_OUT, P, C), axis=1)          # (L_OUT, C)
        outs.append(pooled.T)                                      # (C, L_OUT)
    o_ref[...] = jnp.stack(outs, axis=0).astype(o_ref.dtype)       # (B, C, L_OUT), 1 store


def _kernel_params(params):
    """Torch-layout params -> kernel layout (pure layout plumbing)."""
    w1, b1, g1, be1, w2, b2, g2, be2 = params

    def flat_w(w_t):        # torch (C_out, C_in, KS) -> (KS*C_in, C_out), row = k*C + ci
        return jnp.transpose(w_t, (2, 1, 0)).reshape(KS * C, C)

    row = lambda v: v.reshape(1, C)
    return (flat_w(w1), row(b1), row(g1), row(be1),
            flat_w(w2), row(b2), row(g2), row(be2))


@jax.jit
def resblock_forward(x_ncl, params):
    kp = _kernel_params(params)
    # Whole problem in one invocation: no grid, no BlockSpecs, no scratch, no wrapper
    # transposes.  Everything (a few hundred KiB of weights + a few KiB of activations)
    # lives comfortably in VMEM.
    return pl.pallas_call(
        resblock_kernel,
        out_shape=jax.ShapeDtypeStruct((B, C, L_OUT), jnp.float32),
    )(x_ncl, *kp)


def ref_forward(x_ncl, params):
    """Pure-JAX reference of the same ResBlock math (torch-layout params)."""
    w1, b1, g1, be1, w2, b2, g2, be2 = params

    def block(h_nlc, w_t, b, g, be):
        hp = jnp.pad(h_nlc, ((0, 0), (PAD, PAD), (0, 0)))
        w = jnp.transpose(w_t, (2, 1, 0))                          # (KS, C_in, C_out)
        acc = jnp.zeros((h_nlc.shape[0], L, C), jnp.float32)
        for k in range(KS):
            acc = acc + jnp.einsum('blc,cd->bld', hp[:, k:k + L, :], w[k])
        y = acc + b.reshape(1, 1, C)
        u = jnp.mean(y, axis=-1, keepdims=True)
        s = jnp.mean((y - u) ** 2, axis=-1, keepdims=True)
        y = (y - u) / jnp.sqrt(s + EPS)
        y = g.reshape(1, 1, C) * y + be.reshape(1, 1, C)
        return jnp.maximum(y, 0.0)

    h0 = jnp.transpose(x_ncl, (0, 2, 1))                           # (B, L, C)
    h = block(h0, w1, b1, g1, be1)
    h = block(h, w2, b2, g2, be2)
    z = h + h0
    zp = z[:, :L_OUT * P, :].reshape(z.shape[0], L_OUT, P, C)
    return jnp.transpose(jnp.max(zp, axis=2), (0, 2, 1))           # (B, C, L_OUT)


def make_params(key):
    """Deterministic params with the module's native (torch) layouts."""
    k1, k2, k3, k4 = jax.random.split(key, 4)
    bound = 1.0 / (C * KS) ** 0.5
    w1 = jax.random.uniform(k1, (C, C, KS), jnp.float32, -bound, bound)   # Conv1d weight
    b1 = jax.random.uniform(k2, (C,), jnp.float32, -bound, bound)
    w2 = jax.random.uniform(k3, (C, C, KS), jnp.float32, -bound, bound)
    b2 = jax.random.uniform(k4, (C,), jnp.float32, -bound, bound)
    ones = jnp.ones((C,), jnp.float32)                                    # LayerNorm weight
    zeros = jnp.zeros((C,), jnp.float32)                                  # LayerNorm bias
    return (w1, b1, ones, zeros, w2, b2, ones, zeros)


if __name__ == "__main__":
    key = jax.random.PRNGKey(0)
    kx, kp = jax.random.split(key)
    x = jax.random.normal(kx, (B, C, L), jnp.float32)              # NCL input, like the module
    params = make_params(kp)

    out = jax.block_until_ready(resblock_forward(x, params))
    ref = ref_forward(x, params)

    assert out.shape == (B, C, L_OUT), out.shape
    err = float(jnp.max(jnp.abs(out - ref)))
    assert jnp.allclose(out, ref, rtol=1e-3, atol=1e-3), err
    print("KERNEL_OK")
</pallas_src>

<mosaic_0001>
module attributes {stable_mosaic.version = 11 : i64} {
  func.func @resblock_kernel(%arg0: memref<2x128x16xf32, #tpu.memory_space<vmem>>, %arg1: memref<1152x128xf32, #tpu.memory_space<vmem>>, %arg2: memref<1x128xf32, #tpu.memory_space<vmem>>, %arg3: memref<1x128xf32, #tpu.memory_space<vmem>>, %arg4: memref<1x128xf32, #tpu.memory_space<vmem>>, %arg5: memref<1152x128xf32, #tpu.memory_space<vmem>>, %arg6: memref<1x128xf32, #tpu.memory_space<vmem>>, %arg7: memref<1x128xf32, #tpu.memory_space<vmem>>, %arg8: memref<1x128xf32, #tpu.memory_space<vmem>>, %arg9: memref<2x128x4xf32, #tpu.memory_space<vmem>>) attributes {dimension_semantics = [], scalar_prefetch = 0 : i64, scratch_operands = 0 : i64, tpu.core_type = #tpu.core_type<tc>} {
    %c0 = arith.constant 0 : index
    %c0_0 = arith.constant 0 : index
    %c0_1 = arith.constant 0 : index
    %0 = vector.load %arg0[%c0, %c0_0, %c0_1] : memref<2x128x16xf32, #tpu.memory_space<vmem>>, vector<2x128x16xf32>
    %1 = vector.extract_strided_slice %0 {offsets = [0, 0, 0], sizes = [1, 128, 16], strides = [1, 1, 1]} : vector<2x128x16xf32> to vector<1x128x16xf32>
    %2 = vector.shape_cast %1 : vector<1x128x16xf32> to vector<128x16xf32>
    %3 = tpu.transpose %2, [1, 0] : vector<128x16xf32> -> vector<16x128xf32>
    %4 = vector.extract_strided_slice %0 {offsets = [1, 0, 0], sizes = [1, 128, 16], strides = [1, 1, 1]} : vector<2x128x16xf32> to vector<1x128x16xf32>
    %5 = vector.shape_cast %4 : vector<1x128x16xf32> to vector<128x16xf32>
    %6 = tpu.transpose %5, [1, 0] : vector<128x16xf32> -> vector<16x128xf32>
    %7 = tpu.concatenate %3, %6 in 0 : vector<16x128xf32>, vector<16x128xf32> -> vector<32x128xf32>
    %8 = tpu.iota {dimensions = array<i32: 0>} : vector<16x128xi32>
    %9 = tpu.concatenate %8, %8 in 0 : vector<16x128xi32>, vector<16x128xi32> -> vector<32x128xi32>
    %c0_2 = arith.constant 0 : index
    %c0_3 = arith.constant 0 : index
    %10 = vector.load %arg1[%c0_2, %c0_3] : memref<1152x128xf32, #tpu.memory_space<vmem>>, vector<1152x128xf32>
    %c0_4 = arith.constant 0 : index
    %c0_5 = arith.constant 0 : index
    %11 = vector.load %arg2[%c0_4, %c0_5] : memref<1x128xf32, #tpu.memory_space<vmem>>, vector<1x128xf32>
    %c0_6 = arith.constant 0 : index
    %c0_7 = arith.constant 0 : index
    %12 = vector.load %arg3[%c0_6, %c0_7] : memref<1x128xf32, #tpu.memory_space<vmem>>, vector<1x128xf32>
    %c0_8 = arith.constant 0 : index
    %c0_9 = arith.constant 0 : index
    %13 = vector.load %arg4[%c0_8, %c0_9] : memref<1x128xf32, #tpu.memory_space<vmem>>, vector<1x128xf32>
    %c4_i32 = arith.constant 4 : i32
    %14 = tpu.dynamic_rotate %7 by %c4_i32 dim 0 : vector<32x128xf32>, i32 -> vector<32x128xf32>
    %c4_i32_10 = arith.constant 4 : i32
    %15 = vector.broadcast %c4_i32_10 : i32 to vector<32x128xi32>
    %16 = arith.cmpi sge, %9, %15 : vector<32x128xi32>
    %c20_i32 = arith.constant 20 : i32
    %17 = vector.broadcast %c20_i32 : i32 to vector<32x128xi32>
    %18 = arith.cmpi slt, %9, %17 : vector<32x128xi32>
    %19 = arith.andi %16, %18 : vector<32x128xi1>
    %cst = arith.constant 0.000000e+00 : f32
    %20 = vector.broadcast %cst : f32 to vector<32x128xf32>
    %21 = arith.select %19, %14, %20 : vector<32x128xi1>, vector<32x128xf32>
    %c3_i32 = arith.constant 3 : i32
    %22 = tpu.dynamic_rotate %7 by %c3_i32 dim 0 : vector<32x128xf32>, i32 -> vector<32x128xf32>
    %c3_i32_11 = arith.constant 3 : i32
    %23 = vector.broadcast %c3_i32_11 : i32 to vector<32x128xi32>
    %24 = arith.cmpi sge, %9, %23 : vector<32x128xi32>
    %c19_i32 = arith.constant 19 : i32
    %25 = vector.broadcast %c19_i32 : i32 to vector<32x128xi32>
    %26 = arith.cmpi slt, %9, %25 : vector<32x128xi32>
    %27 = arith.andi %24, %26 : vector<32x128xi1>
    %cst_12 = arith.constant 0.000000e+00 : f32
    %28 = vector.broadcast %cst_12 : f32 to vector<32x128xf32>
    %29 = arith.select %27, %22, %28 : vector<32x128xi1>, vector<32x128xf32>
    %c2_i32 = arith.constant 2 : i32
    %30 = tpu.dynamic_rotate %7 by %c2_i32 dim 0 : vector<32x128xf32>, i32 -> vector<32x128xf32>
    %c2_i32_13 = arith.constant 2 : i32
    %31 = vector.broadcast %c2_i32_13 : i32 to vector<32x128xi32>
    %32 = arith.cmpi sge, %9, %31 : vector<32x128xi32>
    %c18_i32 = arith.constant 18 : i32
    %33 = vector.broadcast %c18_i32 : i32 to vector<32x128xi32>
    %34 = arith.cmpi slt, %9, %33 : vector<32x128xi32>
    %35 = arith.andi %32, %34 : vector<32x128xi1>
    %cst_14 = arith.constant 0.000000e+00 : f32
    %36 = vector.broadcast %cst_14 : f32 to vector<32x128xf32>
    %37 = arith.select %35, %30, %36 : vector<32x128xi1>, vector<32x128xf32>
    %c1_i32 = arith.constant 1 : i32
    %38 = tpu.dynamic_rotate %7 by %c1_i32 dim 0 : vector<32x128xf32>, i32 -> vector<32x128xf32>
    %c1_i32_15 = arith.constant 1 : i32
    %39 = vector.broadcast %c1_i32_15 : i32 to vector<32x128xi32>
    %40 = arith.cmpi sge, %9, %39 : vector<32x128xi32>
    %c17_i32 = arith.constant 17 : i32
    %41 = vector.broadcast %c17_i32 : i32 to vector<32x128xi32>
    %42 = arith.cmpi slt, %9, %41 : vector<32x128xi32>
    %43 = arith.andi %40, %42 : vector<32x128xi1>
    %cst_16 = arith.constant 0.000000e+00 : f32
    %44 = vector.broadcast %cst_16 : f32 to vector<32x128xf32>
    %45 = arith.select %43, %38, %44 : vector<32x128xi1>, vector<32x128xf32>
    %c0_i32 = arith.constant 0 : i32
    %46 = vector.broadcast %c0_i32 : i32 to vector<32x128xi32>
    %47 = arith.cmpi sge, %9, %46 : vector<32x128xi32>
    %c16_i32 = arith.constant 16 : i32
    %48 = vector.broadcast %c16_i32 : i32 to vector<32x128xi32>
    %49 = arith.cmpi slt, %9, %48 : vector<32x128xi32>
    %50 = arith.andi %47, %49 : vector<32x128xi1>
    %cst_17 = arith.constant 0.000000e+00 : f32
    %51 = vector.broadcast %cst_17 : f32 to vector<32x128xf32>
    %52 = arith.select %50, %7, %51 : vector<32x128xi1>, vector<32x128xf32>
    %c31_i32 = arith.constant 31 : i32
    %53 = tpu.dynamic_rotate %7 by %c31_i32 dim 0 : vector<32x128xf32>, i32 -> vector<32x128xf32>
    %c-1_i32 = arith.constant -1 : i32
    %54 = vector.broadcast %c-1_i32 : i32 to vector<32x128xi32>
    %55 = arith.cmpi sge, %9, %54 : vector<32x128xi32>
    %c15_i32 = arith.constant 15 : i32
    %56 = vector.broadcast %c15_i32 : i32 to vector<32x128xi32>
    %57 = arith.cmpi slt, %9, %56 : vector<32x128xi32>
    %58 = arith.andi %55, %57 : vector<32x128xi1>
    %cst_18 = arith.constant 0.000000e+00 : f32
    %59 = vector.broadcast %cst_18 : f32 to vector<32x128xf32>
    %60 = arith.select %58, %53, %59 : vector<32x128xi1>, vector<32x128xf32>
    %c30_i32 = arith.constant 30 : i32
    %61 = tpu.dynamic_rotate %7 by %c30_i32 dim 0 : vector<32x128xf32>, i32 -> vector<32x128xf32>
    %c-2_i32 = arith.constant -2 : i32
    %62 = vector.broadcast %c-2_i32 : i32 to vector<32x128xi32>
    %63 = arith.cmpi sge, %9, %62 : vector<32x128xi32>
    %c14_i32 = arith.constant 14 : i32
    %64 = vector.broadcast %c14_i32 : i32 to vector<32x128xi32>
    %65 = arith.cmpi slt, %9, %64 : vector<32x128xi32>
    %66 = arith.andi %63, %65 : vector<32x128xi1>
    %cst_19 = arith.constant 0.000000e+00 : f32
    %67 = vector.broadcast %cst_19 : f32 to vector<32x128xf32>
    %68 = arith.select %66, %61, %67 : vector<32x128xi1>, vector<32x128xf32>
    %c29_i32 = arith.constant 29 : i32
    %69 = tpu.dynamic_rotate %7 by %c29_i32 dim 0 : vector<32x128xf32>, i32 -> vector<32x128xf32>
    %c-3_i32 = arith.constant -3 : i32
    %70 = vector.broadcast %c-3_i32 : i32 to vector<32x128xi32>
    %71 = arith.cmpi sge, %9, %70 : vector<32x128xi32>
    %c13_i32 = arith.constant 13 : i32
    %72 = vector.broadcast %c13_i32 : i32 to vector<32x128xi32>
    %73 = arith.cmpi slt, %9, %72 : vector<32x128xi32>
    %74 = arith.andi %71, %73 : vector<32x128xi1>
    %cst_20 = arith.constant 0.000000e+00 : f32
    %75 = vector.broadcast %cst_20 : f32 to vector<32x128xf32>
    %76 = arith.select %74, %69, %75 : vector<32x128xi1>, vector<32x128xf32>
    %c28_i32 = arith.constant 28 : i32
    %77 = tpu.dynamic_rotate %7 by %c28_i32 dim 0 : vector<32x128xf32>, i32 -> vector<32x128xf32>
    %c-4_i32 = arith.constant -4 : i32
    %78 = vector.broadcast %c-4_i32 : i32 to vector<32x128xi32>
    %79 = arith.cmpi sge, %9, %78 : vector<32x128xi32>
    %c12_i32 = arith.constant 12 : i32
    %80 = vector.broadcast %c12_i32 : i32 to vector<32x128xi32>
    %81 = arith.cmpi slt, %9, %80 : vector<32x128xi32>
    %82 = arith.andi %79, %81 : vector<32x128xi1>
    %cst_21 = arith.constant 0.000000e+00 : f32
    %83 = vector.broadcast %cst_21 : f32 to vector<32x128xf32>
    %84 = arith.select %82, %77, %83 : vector<32x128xi1>, vector<32x128xf32>
    %85 = tpu.concatenate %21, %29, %37, %45, %52, %60, %68, %76, %84 in 1 : vector<32x128xf32>, vector<32x128xf32>, vector<32x128xf32>, vector<32x128xf32>, vector<32x128xf32>, vector<32x128xf32>, vector<32x128xf32>, vector<32x128xf32>, vector<32x128xf32> -> vector<32x1152xf32>
    %cst_22 = arith.constant dense<0.000000e+00> : vector<32x128xf32>
    %86 = tpu.matmul %85, %10, %cst_22 {dimension_numbers = #tpu.dot_dimension_numbers<[1], [0], [0], [1], [0, 0, 1, 1], [], []>} : vector<32x1152xf32>, vector<1152x128xf32>, vector<32x128xf32> -> vector<32x128xf32>
    %87 = vector.broadcast %11 : vector<1x128xf32> to vector<32x128xf32>
    %88 = arith.addf %86, %87 : vector<32x128xf32>
    %cst_23 = arith.constant dense<0.000000e+00> : vector<32xf32>
    %89 = vector.multi_reduction <add>, %88, %cst_23 [1] : vector<32x128xf32> to vector<32xf32>
    %90 = vector.shape_cast %89 : vector<32xf32> to vector<32x1xf32>
    %cst_24 = arith.constant 1.280000e+02 : f32
    %91 = vector.broadcast %cst_24 : f32 to vector<32x1xf32>
    %92 = arith.divf %90, %91 : vector<32x1xf32>
    %93 = vector.broadcast %92 : vector<32x1xf32> to vector<32x128xf32>
    %94 = arith.subf %88, %93 : vector<32x128xf32>
    %95 = arith.mulf %94, %94 : vector<32x128xf32>
    %cst_25 = arith.constant dense<0.000000e+00> : vector<32xf32>
    %96 = vector.multi_reduction <add>, %95, %cst_25 [1] : vector<32x128xf32> to vector<32xf32>
    %97 = vector.shape_cast %96 : vector<32xf32> to vector<32x1xf32>
    %cst_26 = arith.constant 1.280000e+02 : f32
    %98 = vector.broadcast %cst_26 : f32 to vector<32x1xf32>
    %99 = arith.divf %97, %98 : vector<32x1xf32>
    %100 = vector.broadcast %92 : vector<32x1xf32> to vector<32x128xf32>
    %101 = arith.subf %88, %100 : vector<32x128xf32>
    %cst_27 = arith.constant 9.99999997E-7 : f32
    %102 = vector.broadcast %cst_27 : f32 to vector<32x1xf32>
    %103 = arith.addf %99, %102 : vector<32x1xf32>
    %104 = math.rsqrt %103 : vector<32x1xf32>
    %105 = vector.broadcast %104 : vector<32x1xf32> to vector<32x128xf32>
    %106 = arith.mulf %101, %105 : vector<32x128xf32>
    %107 = vector.broadcast %12 : vector<1x128xf32> to vector<32x128xf32>
    %108 = arith.mulf %107, %106 : vector<32x128xf32>
    %109 = vector.broadcast %13 : vector<1x128xf32> to vector<32x128xf32>
    %110 = arith.addf %108, %109 : vector<32x128xf32>
    %cst_28 = arith.constant 0.000000e+00 : f32
    %111 = vector.broadcast %cst_28 : f32 to vector<32x128xf32>
    %112 = arith.maximumf %110, %111 : vector<32x128xf32>
    %c0_29 = arith.constant 0 : index
    %c0_30 = arith.constant 0 : index
    %113 = vector.load %arg5[%c0_29, %c0_30] : memref<1152x128xf32, #tpu.memory_space<vmem>>, vector<1152x128xf32>
    %c0_31 = arith.constant 0 : index
    %c0_32 = arith.constant 0 : index
    %114 = vector.load %arg6[%c0_31, %c0_32] : memref<1x128xf32, #tpu.memory_space<vmem>>, vector<1x128xf32>
    %c0_33 = arith.constant 0 : index
    %c0_34 = arith.constant 0 : index
    %115 = vector.load %arg7[%c0_33, %c0_34] : memref<1x128xf32, #tpu.memory_space<vmem>>, vector<1x128xf32>
    %c0_35 = arith.constant 0 : index
    %c0_36 = arith.constant 0 : index
    %116 = vector.load %arg8[%c0_35, %c0_36] : memref<1x128xf32, #tpu.memory_space<vmem>>, vector<1x128xf32>
    %c4_i32_37 = arith.constant 4 : i32
    %117 = tpu.dynamic_rotate %112 by %c4_i32_37 dim 0 : vector<32x128xf32>, i32 -> vector<32x128xf32>
    %c4_i32_38 = arith.constant 4 : i32
    %118 = vector.broadcast %c4_i32_38 : i32 to vector<32x128xi32>
    %119 = arith.cmpi sge, %9, %118 : vector<32x128xi32>
    %c20_i32_39 = arith.constant 20 : i32
    %120 = vector.broadcast %c20_i32_39 : i32 to vector<32x128xi32>
    %121 = arith.cmpi slt, %9, %120 : vector<32x128xi32>
    %122 = arith.andi %119, %121 : vector<32x128xi1>
    %cst_40 = arith.constant 0.000000e+00 : f32
    %123 = vector.broadcast %cst_40 : f32 to vector<32x128xf32>
    %124 = arith.select %122, %117, %123 : vector<32x128xi1>, vector<32x128xf32>
    %c3_i32_41 = arith.constant 3 : i32
    %125 = tpu.dynamic_rotate %112 by %c3_i32_41 dim 0 : vector<32x128xf32>, i32 -> vector<32x128xf32>
    %c3_i32_42 = arith.constant 3 : i32
    %126 = vector.broadcast %c3_i32_42 : i32 to vector<32x128xi32>
    %127 = arith.cmpi sge, %9, %126 : vector<32x128xi32>
    %c19_i32_43 = arith.constant 19 : i32
    %128 = vector.broadcast %c19_i32_43 : i32 to vector<32x128xi32>
    %129 = arith.cmpi slt, %9, %128 : vector<32x128xi32>
    %130 = arith.andi %127, %129 : vector<32x128xi1>
    %cst_44 = arith.constant 0.000000e+00 : f32
    %131 = vector.broadcast %cst_44 : f32 to vector<32x128xf32>
    %132 = arith.select %130, %125, %131 : vector<32x128xi1>, vector<32x128xf32>
    %c2_i32_45 = arith.constant 2 : i32
    %133 = tpu.dynamic_rotate %112 by %c2_i32_45 dim 0 : vector<32x128xf32>, i32 -> vector<32x128xf32>
    %c2_i32_46 = arith.constant 2 : i32
    %134 = vector.broadcast %c2_i32_46 : i32 to vector<32x128xi32>
    %135 = arith.cmpi sge, %9, %134 : vector<32x128xi32>
    %c18_i32_47 = arith.constant 18 : i32
    %136 = vector.broadcast %c18_i32_47 : i32 to vector<32x128xi32>
    %137 = arith.cmpi slt, %9, %136 : vector<32x128xi32>
    %138 = arith.andi %135, %137 : vector<32x128xi1>
    %cst_48 = arith.constant 0.000000e+00 : f32
    %139 = vector.broadcast %cst_48 : f32 to vector<32x128xf32>
    %140 = arith.select %138, %133, %139 : vector<32x128xi1>, vector<32x128xf32>
    %c1_i32_49 = arith.constant 1 : i32
    %141 = tpu.dynamic_rotate %112 by %c1_i32_49 dim 0 : vector<32x128xf32>, i32 -> vector<32x128xf32>
    %c1_i32_50 = arith.constant 1 : i32
    %142 = vector.broadcast %c1_i32_50 : i32 to vector<32x128xi32>
    %143 = arith.cmpi sge, %9, %142 : vector<32x128xi32>
    %c17_i32_51 = arith.constant 17 : i32
    %144 = vector.broadcast %c17_i32_51 : i32 to vector<32x128xi32>
    %145 = arith.cmpi slt, %9, %144 : vector<32x128xi32>
    %146 = arith.andi %143, %145 : vector<32x128xi1>
    %cst_52 = arith.constant 0.000000e+00 : f32
    %147 = vector.broadcast %cst_52 : f32 to vector<32x128xf32>
    %148 = arith.select %146, %141, %147 : vector<32x128xi1>, vector<32x128xf32>
    %c0_i32_53 = arith.constant 0 : i32
    %149 = vector.broadcast %c0_i32_53 : i32 to vector<32x128xi32>
    %150 = arith.cmpi sge, %9, %149 : vector<32x128xi32>
    %c16_i32_54 = arith.constant 16 : i32
    %151 = vector.broadcast %c16_i32_54 : i32 to vector<32x128xi32>
    %152 = arith.cmpi slt, %9, %151 : vector<32x128xi32>
    %153 = arith.andi %150, %152 : vector<32x128xi1>
    %cst_55 = arith.constant 0.000000e+00 : f32
    %154 = vector.broadcast %cst_55 : f32 to vector<32x128xf32>
    %155 = arith.select %153, %112, %154 : vector<32x128xi1>, vector<32x128xf32>
    %c31_i32_56 = arith.constant 31 : i32
    %156 = tpu.dynamic_rotate %112 by %c31_i32_56 dim 0 : vector<32x128xf32>, i32 -> vector<32x128xf32>
    %c-1_i32_57 = arith.constant -1 : i32
    %157 = vector.broadcast %c-1_i32_57 : i32 to vector<32x128xi32>
    %158 = arith.cmpi sge, %9, %157 : vector<32x128xi32>
    %c15_i32_58 = arith.constant 15 : i32
    %159 = vector.broadcast %c15_i32_58 : i32 to vector<32x128xi32>
    %160 = arith.cmpi slt, %9, %159 : vector<32x128xi32>
    %161 = arith.andi %158, %160 : vector<32x128xi1>
    %cst_59 = arith.constant 0.000000e+00 : f32
    %162 = vector.broadcast %cst_59 : f32 to vector<32x128xf32>
    %163 = arith.select %161, %156, %162 : vector<32x128xi1>, vector<32x128xf32>
    %c30_i32_60 = arith.constant 30 : i32
    %164 = tpu.dynamic_rotate %112 by %c30_i32_60 dim 0 : vector<32x128xf32>, i32 -> vector<32x128xf32>
    %c-2_i32_61 = arith.constant -2 : i32
    %165 = vector.broadcast %c-2_i32_61 : i32 to vector<32x128xi32>
    %166 = arith.cmpi sge, %9, %165 : vector<32x128xi32>
    %c14_i32_62 = arith.constant 14 : i32
    %167 = vector.broadcast %c14_i32_62 : i32 to vector<32x128xi32>
    %168 = arith.cmpi slt, %9, %167 : vector<32x128xi32>
    %169 = arith.andi %166, %168 : vector<32x128xi1>
    %cst_63 = arith.constant 0.000000e+00 : f32
    %170 = vector.broadcast %cst_63 : f32 to vector<32x128xf32>
    %171 = arith.select %169, %164, %170 : vector<32x128xi1>, vector<32x128xf32>
    %c29_i32_64 = arith.constant 29 : i32
    %172 = tpu.dynamic_rotate %112 by %c29_i32_64 dim 0 : vector<32x128xf32>, i32 -> vector<32x128xf32>
    %c-3_i32_65 = arith.constant -3 : i32
    %173 = vector.broadcast %c-3_i32_65 : i32 to vector<32x128xi32>
    %174 = arith.cmpi sge, %9, %173 : vector<32x128xi32>
    %c13_i32_66 = arith.constant 13 : i32
    %175 = vector.broadcast %c13_i32_66 : i32 to vector<32x128xi32>
    %176 = arith.cmpi slt, %9, %175 : vector<32x128xi32>
    %177 = arith.andi %174, %176 : vector<32x128xi1>
    %cst_67 = arith.constant 0.000000e+00 : f32
    %178 = vector.broadcast %cst_67 : f32 to vector<32x128xf32>
    %179 = arith.select %177, %172, %178 : vector<32x128xi1>, vector<32x128xf32>
    %c28_i32_68 = arith.constant 28 : i32
    %180 = tpu.dynamic_rotate %112 by %c28_i32_68 dim 0 : vector<32x128xf32>, i32 -> vector<32x128xf32>
    %c-4_i32_69 = arith.constant -4 : i32
    %181 = vector.broadcast %c-4_i32_69 : i32 to vector<32x128xi32>
    %182 = arith.cmpi sge, %9, %181 : vector<32x128xi32>
    %c12_i32_70 = arith.constant 12 : i32
    %183 = vector.broadcast %c12_i32_70 : i32 to vector<32x128xi32>
    %184 = arith.cmpi slt, %9, %183 : vector<32x128xi32>
    %185 = arith.andi %182, %184 : vector<32x128xi1>
    %cst_71 = arith.constant 0.000000e+00 : f32
    %186 = vector.broadcast %cst_71 : f32 to vector<32x128xf32>
    %187 = arith.select %185, %180, %186 : vector<32x128xi1>, vector<32x128xf32>
    %188 = tpu.concatenate %124, %132, %140, %148, %155, %163, %171, %179, %187 in 1 : vector<32x128xf32>, vector<32x128xf32>, vector<32x128xf32>, vector<32x128xf32>, vector<32x128xf32>, vector<32x128xf32>, vector<32x128xf32>, vector<32x128xf32>, vector<32x128xf32> -> vector<32x1152xf32>
    %cst_72 = arith.constant dense<0.000000e+00> : vector<32x128xf32>
    %189 = tpu.matmul %188, %113, %cst_72 {dimension_numbers = #tpu.dot_dimension_numbers<[1], [0], [0], [1], [0, 0, 1, 1], [], []>} : vector<32x1152xf32>, vector<1152x128xf32>, vector<32x128xf32> -> vector<32x128xf32>
    %190 = vector.broadcast %114 : vector<1x128xf32> to vector<32x128xf32>
    %191 = arith.addf %189, %190 : vector<32x128xf32>
    %cst_73 = arith.constant dense<0.000000e+00> : vector<32xf32>
    %192 = vector.multi_reduction <add>, %191, %cst_73 [1] : vector<32x128xf32> to vector<32xf32>
    %193 = vector.shape_cast %192 : vector<32xf32> to vector<32x1xf32>
    %cst_74 = arith.constant 1.280000e+02 : f32
    %194 = vector.broadcast %cst_74 : f32 to vector<32x1xf32>
    %195 = arith.divf %193, %194 : vector<32x1xf32>
    %196 = vector.broadcast %195 : vector<32x1xf32> to vector<32x128xf32>
    %197 = arith.subf %191, %196 : vector<32x128xf32>
    %198 = arith.mulf %197, %197 : vector<32x128xf32>
    %cst_75 = arith.constant dense<0.000000e+00> : vector<32xf32>
    %199 = vector.multi_reduction <add>, %198, %cst_75 [1] : vector<32x128xf32> to vector<32xf32>
    %200 = vector.shape_cast %199 : vector<32xf32> to vector<32x1xf32>
    %cst_76 = arith.constant 1.280000e+02 : f32
    %201 = vector.broadcast %cst_76 : f32 to vector<32x1xf32>
    %202 = arith.divf %200, %201 : vector<32x1xf32>
    %203 = vector.broadcast %195 : vector<32x1xf32> to vector<32x128xf32>
    %204 = arith.subf %191, %203 : vector<32x128xf32>
    %cst_77 = arith.constant 9.99999997E-7 : f32
    %205 = vector.broadcast %cst_77 : f32 to vector<32x1xf32>
    %206 = arith.addf %202, %205 : vector<32x1xf32>
    %207 = math.rsqrt %206 : vector<32x1xf32>
    %208 = vector.broadcast %207 : vector<32x1xf32> to vector<32x128xf32>
    %209 = arith.mulf %204, %208 : vector<32x128xf32>
    %210 = vector.broadcast %115 : vector<1x128xf32> to vector<32x128xf32>
    %211 = arith.mulf %210, %209 : vector<32x128xf32>
    %212 = vector.broadcast %116 : vector<1x128xf32> to vector<32x128xf32>
    %213 = arith.addf %211, %212 : vector<32x128xf32>
    %cst_78 = arith.constant 0.000000e+00 : f32
    %214 = vector.broadcast %cst_78 : f32 to vector<32x128xf32>
    %215 = arith.maximumf %213, %214 : vector<32x128xf32>
    %216 = arith.addf %215, %7 : vector<32x128xf32>
    %217 = vector.extract_strided_slice %216 {offsets = [0, 0], sizes = [16, 128], strides = [1, 1]} : vector<32x128xf32> to vector<16x128xf32>
    %218 = vector.shape_cast %217 : vector<16x128xf32> to vector<4x4x128xf32>
    %cst_79 = arith.constant dense<0xFF800000> : vector<4x128xf32>
    %219 = vector.multi_reduction <maximumf>, %218, %cst_79 [1] : vector<4x4x128xf32> to vector<4x128xf32>
    %220 = tpu.transpose %219, [1, 0] : vector<4x128xf32> -> vector<128x4xf32>
    %221 = vector.extract_strided_slice %216 {offsets = [16, 0], sizes = [16, 128], strides = [1, 1]} : vector<32x128xf32> to vector<16x128xf32>
    %222 = vector.shape_cast %221 : vector<16x128xf32> to vector<4x4x128xf32>
    %cst_80 = arith.constant dense<0xFF800000> : vector<4x128xf32>
    %223 = vector.multi_reduction <maximumf>, %222, %cst_80 [1] : vector<4x4x128xf32> to vector<4x128xf32>
    %224 = tpu.transpose %223, [1, 0] : vector<4x128xf32> -> vector<128x4xf32>
    %225 = vector.shape_cast %220 : vector<128x4xf32> to vector<1x128x4xf32>
    %226 = vector.shape_cast %224 : vector<128x4xf32> to vector<1x128x4xf32>
    %227 = tpu.concatenate %225, %226 in 0 : vector<1x128x4xf32>, vector<1x128x4xf32> -> vector<2x128x4xf32>
    %c0_81 = arith.constant 0 : index
    %c0_82 = arith.constant 0 : index
    %c0_83 = arith.constant 0 : index
    %228 = vector.load %arg9[%c0_81, %c0_82, %c0_83] : memref<2x128x4xf32, #tpu.memory_space<vmem>>, vector<2x128x4xf32>
    tpu.vector_store %arg9[%c0_81, %c0_82, %c0_83], %227 {strides = array<i32>} : memref<2x128x4xf32, #tpu.memory_space<vmem>>, vector<2x128x4xf32>,
    return
  }
}

</mosaic_0001>

<bundles_post_ra>
// kernel: resblock_forward.1
= control target key start
LH: loop header
LB: loop body
LE: loop exit
PB: predicated region body
PF: predicated region fallthrough
CT: control target
= control target key end

     0   :  { %vm1679_vm15 = vcmask 1043456   ;;  %s4271_s0 = inlined_call_operand.vmem [shape: f32[2,128,16], index: 0, kind: input, shape index: {}]   ;;  %s4272_s1 = inlined_call_operand.vmem [shape: f32[1152,128], index: 1, kind: input, shape index: {}]   ;;  %s4273_s2 = inlined_call_operand.vmem [shape: f32[1,128], index: 2, kind: input, shape index: {}]   ;;  %s4274_s5 = inlined_call_operand.vmem [shape: f32[1152,128], index: 5, kind: input, shape index: {}]   ;;  %s4275_s3 = inlined_call_operand.vmem [shape: f32[1,128], index: 3, kind: input, shape index: {}]   ;;  %s4276_s4 = inlined_call_operand.vmem [shape: f32[1,128], index: 4, kind: input, shape index: {}]   ;;  %s4277_s6 = inlined_call_operand.vmem [shape: f32[1,128], index: 6, kind: input, shape index: {}]   ;;  %s4278_s7 = inlined_call_operand.vmem [shape: f32[1,128], index: 7, kind: input, shape index: {}]   ;;  %s4279_s8 = inlined_call_operand.vmem [shape: f32[1,128], index: 8, kind: input, shape index: {}]   ;;  %s4280_s9 = inlined_call_operand.vmem [shape: f32[2,128,4], index: 9, kind: output, shape index: {}]  }
   0x1   :  { %v48_v0 = vld [vmem:[%s4271_s0 + $0x80] sm:$0xff]  ;;  %v49_v2 = vld [vmem:[%s4271_s0 + $0x88] sm:$0xff]  ;;  %v50_v4 = vld [vmem:[%s4271_s0 + $0x90] sm:$0xff] }
   0x2   :  { %v32_v1 = vld [vmem:[%s4271_s0] sm:$0xff]  ;;  %96 = vxpose.xlu0.b32.start [1/16] (narrow) %v48_v0, 16  ;;  %v33_v3 = vld [vmem:[%s4271_s0 + $0x8] sm:$0xff]  ;;  %v34_v5 = vld [vmem:[%s4271_s0 + $0x10] sm:$0xff] }
   0x3   :  { %64 = vxpose.xlu1.b32.start [1/16] (narrow) %v32_v1, 16  ;;  %v51_v6 = vld [vmem:[%s4271_s0 + $0x98] sm:$0xff]  ;;  %v147_v8 = vld [vmem:[%s4272_s1 + $0x80] sm:$0xff]  ;;  %v148_v9 = vld [vmem:[%s4272_s1 + $0x88] sm:$0xff] }
   0x4   :  { %v35_v7 = vld [vmem:[%s4271_s0 + $0x18] sm:$0xff]  ;;  %v179_v10 = vld [vmem:[%s4272_s1 + $0x180] sm:$0xff]  ;;  %v180_v11 = vld [vmem:[%s4272_s1 + $0x188] sm:$0xff]  ;;  %v2368_v14 = vpack.c.bf16 %v148_v9, %v147_v8 }
   0x5   :  { %v52_v12 = vld [vmem:[%s4271_s0 + $0xa0] sm:$0xff]  ;;  %v2400_v15 = vpack.c.bf16 %v180_v11, %v179_v10  ;;  %v132_v17 = vld [vmem:[%s4272_s1 + $0x8] sm:$0xff]  ;;  %v149_v21 = vld [vmem:[%s4272_s1 + $0x90] sm:$0xff] }
   0x6   :  { %97 = vxpose.xlu0.b32.cont [2/16] (narrow) %v49_v2, 16  ;;  %v36_v13 = vld [vmem:[%s4271_s0 + $0x20] sm:$0xff]  ;;  %v164_v20 = vld [vmem:[%s4272_s1 + $0x108] sm:$0xff]  ;;  %v150_v22 = vld [vmem:[%s4272_s1 + $0x98] sm:$0xff]  ;;  %2369 = vmatprep.subr.bf16.mxu0 %v2368_v14 }
   0x7   :  { %65 = vxpose.xlu1.b32.cont [2/16] (narrow) %v33_v3, 16  ;;  %v131_v16 = vld [vmem:[%s4272_s1] sm:$0xff]  ;;  %2401 = vmatprep.subr.bf16.mxu1 %v2400_v15  ;;  %v2372_v24 = vpack.c.bf16 %v150_v22, %v149_v21  ;;  %v181_v25 = vld [vmem:[%s4272_s1 + $0x190] sm:$0xff]  ;;  %v182_v26 = vld [vmem:[%s4272_s1 + $0x198] sm:$0xff] }
   0x8   :  { %v163_v18 = vld [vmem:[%s4272_s1 + $0x100] sm:$0xff]  ;;  %v2370_v19 = vpack.c.bf16 %v132_v17, %v131_v16  ;;  %v133_v27 = vld [vmem:[%s4272_s1 + $0x10] sm:$0xff]  ;;  %v2404_v28 = vpack.c.bf16 %v182_v26, %v181_v25  ;;  %v134_v29 = vld [vmem:[%s4272_s1 + $0x18] sm:$0xff] }
   0x9   :  { %v2402_v23 = vpack.c.bf16 %v164_v20, %v163_v18  ;;  %v165_v30 = vld [vmem:[%s4272_s1 + $0x110] sm:$0xff]  ;;  %v166_v31 = vld [vmem:[%s4272_s1 + $0x118] sm:$0xff]  ;;  %v53_v32 = vld [vmem:[%s4271_s0 + $0xa8] sm:$0xff]  ;;  %v2374_v34 = vpack.c.bf16 %v134_v29, %v133_v27 }
   0xa   :  { %98 = vxpose.xlu0.b32.cont [3/16] (narrow) %v50_v4, 16  ;;  %2371 = vmatpush3.bf16.msra.mxu0 %v2370_v19  ;;  %v37_v33 = vld [vmem:[%s4271_s0 + $0x28] sm:$0xff]  ;;  %v2406_v35 = vpack.c.bf16 %v166_v31, %v165_v30  ;;  %v151_v36 = vld [vmem:[%s4272_s1 + $0xa0] sm:$0xff]  ;;  %v153_v46 = vld [vmem:[%s4272_s1 + $0xb0] sm:$0xff] }
   0xb   :  { %66 = vxpose.xlu1.b32.cont [3/16] (narrow) %v34_v5, 16  ;;  %2403 = vmatpush3.bf16.msra.mxu1 %v2402_v23  ;;  %v152_v37 = vld [vmem:[%s4272_s1 + $0xa8] sm:$0xff]  ;;  %v183_v38 = vld [vmem:[%s4272_s1 + $0x1a0] sm:$0xff]  ;;  %v154_v48 = vld [vmem:[%s4272_s1 + $0xb8] sm:$0xff] }
   0xc   :  { %2373 = vmatprep.subr.bf16.mxu0 %v2372_v24  ;;  %v2376_v39 = vpack.c.bf16 %v152_v37, %v151_v36  ;;  %v184_v40 = vld [vmem:[%s4272_s1 + $0x1a8] sm:$0xff]  ;;  %v135_v41 = vld [vmem:[%s4272_s1 + $0x20] sm:$0xff]  ;;  %2405 = vmatprep.subr.bf16.mxu1 %v2404_v28  ;;  %v185_v49 = vld [vmem:[%s4272_s1 + $0x1b0] sm:$0xff]  ;;  %v2380_v52 = vpack.c.bf16 %v154_v48, %v153_v46 }
   0xd   :  { %v136_v42 = vld [vmem:[%s4272_s1 + $0x28] sm:$0xff]  ;;  %v2408_v43 = vpack.c.bf16 %v184_v40, %v183_v38  ;;  %v167_v44 = vld [vmem:[%s4272_s1 + $0x120] sm:$0xff]  ;;  %v186_v50 = vld [vmem:[%s4272_s1 + $0x1b8] sm:$0xff] }
   0xe   :  { %99 = vxpose.xlu0.b32.cont [4/16] (narrow) %v51_v6, 16  ;;  %v168_v45 = vld [vmem:[%s4272_s1 + $0x128] sm:$0xff]  ;;  %2375 = vmatpush3.bf16.msra.mxu0 %v2374_v34  ;;  %v2378_v47 = vpack.c.bf16 %v136_v42, %v135_v41  ;;  %v137_v53 = vld [vmem:[%s4272_s1 + $0x30] sm:$0xff]  ;;  %v138_v54 = vld [vmem:[%s4272_s1 + $0x38] sm:$0xff]  ;;  %v2412_v61 = vpack.c.bf16 %v186_v50, %v185_v49 }
   0xf   :  { %67 = vxpose.xlu1.b32.cont [4/16] (narrow) %v35_v7, 16  ;;  %2407 = vmatpush3.bf16.msra.mxu1 %v2406_v35  ;;  %v2410_v51 = vpack.c.bf16 %v168_v45, %v167_v44  ;;  %v169_v55 = vld [vmem:[%s4272_s1 + $0x130] sm:$0xff]  ;;  %v170_v56 = vld [vmem:[%s4272_s1 + $0x138] sm:$0xff]  ;;  %v155_v57 = vld [vmem:[%s4272_s1 + $0xc0] sm:$0xff]  ;;  %v2382_v62 = vpack.c.bf16 %v138_v54, %v137_v53 }
  0x10   :  { %2377 = vmatprep.subr.bf16.mxu0 %v2376_v39  ;;  %v156_v58 = vld [vmem:[%s4272_s1 + $0xc8] sm:$0xff]  ;;  %v54_v59 = vld [vmem:[%s4271_s0 + $0xb0] sm:$0xff]  ;;  %2409 = vmatprep.subr.bf16.mxu1 %v2408_v43  ;;  %v187_v63 = vld [vmem:[%s4272_s1 + $0x1c0] sm:$0xff]  ;;  %v2414_v1 = vpack.c.bf16 %v170_v56, %v169_v55 }
  0x11   :  { %v38_v60 = vld [vmem:[%s4271_s0 + $0x30] sm:$0xff]  ;;  %v188_v0 = vld [vmem:[%s4272_s1 + $0x1c8] sm:$0xff]  ;;  %v2384_v2 = vpack.c.bf16 %v156_v58, %v155_v57  ;;  %v139_v3 = vld [vmem:[%s4272_s1 + $0x40] sm:$0xff] }
  0x12   :  { %100 = vxpose.xlu0.b32.cont [5/16] (narrow) %v52_v12, 16  ;;  %2379 = vmatpush3.bf16.msra.mxu0 %v2378_v47  ;;  %v140_v4 = vld [vmem:[%s4272_s1 + $0x48] sm:$0xff]  ;;  %v171_v5 = vld [vmem:[%s4272_s1 + $0x140] sm:$0xff]  ;;  %v157_v7 = vld [vmem:[%s4272_s1 + $0xd0] sm:$0xff]  ;;  %v2416_v11 = vpack.c.bf16 %v188_v0, %v187_v63 }
  0x13   :  { %68 = vxpose.xlu1.b32.cont [5/16] (narrow) %v36_v13, 16  ;;  %2411 = vmatpush3.bf16.msra.mxu1 %v2410_v51  ;;  %v172_v6 = vld [vmem:[%s4272_s1 + $0x148] sm:$0xff]  ;;  %v158_v8 = vld [vmem:[%s4272_s1 + $0xd8] sm:$0xff]  ;;  %v2386_v12 = vpack.c.bf16 %v140_v4, %v139_v3  ;;  %v189_v13 = vld [vmem:[%s4272_s1 + $0x1d0] sm:$0xff] }
  0x14   :  { %2381 = vmatprep.subr.bf16.mxu0 %v2380_v52  ;;  %v55_v9 = vld [vmem:[%s4271_s0 + $0xb8] sm:$0xff]  ;;  %2413 = vmatprep.subr.bf16.mxu1 %v2412_v61  ;;  %v2418_v15 = vpack.c.bf16 %v172_v6, %v171_v5  ;;  %v2388_v16 = vpack.c.bf16 %v158_v8, %v157_v7  ;;  %v141_v17 = vld [vmem:[%s4272_s1 + $0x50] sm:$0xff]  ;;  %v159_v21 = vld [vmem:[%s4272_s1 + $0xe0] sm:$0xff]  ;;  %v128_v6 = vlaneseq }
  0x15   :  { %v39_v10 = vld [vmem:[%s4271_s0 + $0x38] sm:$0xff]  ;;  %v173_v19 = vld [vmem:[%s4272_s1 + $0x150] sm:$0xff]  ;;  %v160_v22 = vld [vmem:[%s4272_s1 + $0xe8] sm:$0xff] }
  0x16   :  { %101 = vxpose.xlu0.b32.cont [6/16] (narrow) %v53_v32, 16  ;;  %2383 = vmatpush3.bf16.msra.mxu0 %v2382_v62  ;;  %v190_v14 = vld [vmem:[%s4272_s1 + $0x1d8] sm:$0xff]  ;;  %v56_v23 = vld [vmem:[%s4271_s0 + $0xc0] sm:$0xff]  ;;  %v192_v28 = vld [vmem:[%s4272_s1 + $0x1e8] sm:$0xff]  ;;  %v2392_v30 = vpack.c.bf16 %v160_v22, %v159_v21  ;;  %v3055_v7 = vshrl.u32 %v128_v6, 7 }
  0x17   :  { %69 = vxpose.xlu1.b32.cont [6/16] (narrow) %v37_v33, 16  ;;  %2415 = vmatpush3.bf16.msra.mxu1 %v2414_v1  ;;  %v142_v18 = vld [vmem:[%s4272_s1 + $0x58] sm:$0xff]  ;;  %v40_v24 = vld [vmem:[%s4271_s0 + $0x40] sm:$0xff]  ;;  %v2420_v25 = vpack.c.bf16 %v190_v14, %v189_v13  ;;  %v144_v32 = vld [vmem:[%s4272_s1 + $0x68] sm:$0xff] }
  0x18   :  { %2385 = vmatprep.subr.bf16.mxu0 %v2384_v2  ;;  %v174_v20 = vld [vmem:[%s4272_s1 + $0x158] sm:$0xff]  ;;  %2417 = vmatprep.subr.bf16.mxu1 %v2416_v11  ;;  %v2390_v26 = vpack.c.bf16 %v142_v18, %v141_v17  ;;  %v191_v27 = vld [vmem:[%s4272_s1 + $0x1e0] sm:$0xff]  ;;  %v176_v34 = vld [vmem:[%s4272_s1 + $0x168] sm:$0xff]  ;;  %vm301_vm0 = vcmp.lt.s32.totalorder %v3055_v7, 3  ;;  %vm306_vm1 = vcmp.ge.s32.totalorder %v3055_v7, 3  ;;  %vm339_vm2 = vcmp.lt.s32.totalorder %v3055_v7, 1 }
  0x19   :  { %v2422_v29 = vpack.c.bf16 %v174_v20, %v173_v19  ;;  %v143_v31 = vld [vmem:[%s4272_s1 + $0x60] sm:$0xff]  ;;  %v161_v35 = vld [vmem:[%s4272_s1 + $0xf0] sm:$0xff]  ;;  %v162_v36 = vld [vmem:[%s4272_s1 + $0xf8] sm:$0xff]  ;;  %v2424_v39 = vpack.c.bf16 %v192_v28, %v191_v27  ;;  %vm282_vm3 = vcmp.lt.s32.totalorder %v3055_v7, 4  ;;  %vm344_vm4 = vcmp.ge.s32.totalorder %v3055_v7, 1 }
  0x1a   :  { %102 = vxpose.xlu0.b32.cont [7/16] (narrow) %v54_v59, 16  ;;  %2387 = vmatpush3.bf16.msra.mxu0 %v2386_v12  ;;  %v175_v33 = vld [vmem:[%s4272_s1 + $0x160] sm:$0xff]  ;;  %v57_v37 = vld [vmem:[%s4271_s0 + $0xc8] sm:$0xff]  ;;  %v2394_v40 = vpack.c.bf16 %v144_v32, %v143_v31  ;;  %v193_v41 = vld [vmem:[%s4272_s1 + $0x1f0] sm:$0xff]  ;;  %v2396_v44 = vpack.c.bf16 %v162_v36, %v161_v35  ;;  %vm287_vm5 = vcmp.ge.s32.totalorder %v3055_v7, 4  ;;  %vm320_vm6 = vcmp.lt.s32.totalorder %v3055_v7, 2 }
  0x1b   :  { %70 = vxpose.xlu1.b32.cont [7/16] (narrow) %v38_v60, 16  ;;  %2419 = vmatpush3.bf16.msra.mxu1 %v2418_v15  ;;  %v41_v38 = vld [vmem:[%s4271_s0 + $0x48] sm:$0xff]  ;;  %v194_v42 = vld [vmem:[%s4272_s1 + $0x1f8] sm:$0xff]  ;;  %v2426_v43 = vpack.c.bf16 %v176_v34, %v175_v33  ;;  %v145_v45 = vld [vmem:[%s4272_s1 + $0x70] sm:$0xff]  ;;  %vm325_vm7 = vcmp.ge.s32.totalorder %v3055_v7, 2  ;;  %vm368_vm8 = vcmp.lt.s32.totalorder %v3055_v7, 7 }
  0x1c   :  { %2389 = vmatprep.subr.bf16.mxu0 %v2388_v16  ;;  %2421 = vmatprep.subr.bf16.mxu1 %v2420_v25  ;;  %v146_v46 = vld [vmem:[%s4272_s1 + $0x78] sm:$0xff]  ;;  %v177_v47 = vld [vmem:[%s4272_s1 + $0x170] sm:$0xff]  ;;  %v211_v49 = vld [vmem:[%s4272_s1 + $0x280] sm:$0xff]  ;;  %v2428_v53 = vpack.c.bf16 %v194_v42, %v193_v41  ;;  %vm406_vm9 = vcmp.lt.s32.totalorder %v3055_v7, 5  ;;  %vm387_vm10 = vcmp.lt.s32.totalorder %v3055_v7, 6 }
  0x1d   :  { %v178_v48 = vld [vmem:[%s4272_s1 + $0x178] sm:$0xff]  ;;  %v212_v50 = vld [vmem:[%s4272_s1 + $0x288] sm:$0xff]  ;;  %v58_v51 = vld [vmem:[%s4271_s0 + $0xd0] sm:$0xff]  ;;  %v2398_v54 = vpack.c.bf16 %v146_v46, %v145_v45 }
  0x1e   :  { %103 = vxpose.xlu0.b32.cont [8/16] (narrow) %v55_v9, 16  ;;  %2391 = vmatpush3.bf16.msra.mxu0 %v2390_v26  ;;  %v42_v52 = vld [vmem:[%s4271_s0 + $0x50] sm:$0xff]  ;;  %v243_v55 = vld [vmem:[%s4272_s1 + $0x380] sm:$0xff]  ;;  %v244_v56 = vld [vmem:[%s4272_s1 + $0x388] sm:$0xff]  ;;  %v2430_v57 = vpack.c.bf16 %v178_v48, %v177_v47  ;;  %v2432_v58 = vpack.c.bf16 %v212_v50, %v211_v49 }
  0x1f   :  { %71 = vxpose.xlu1.b32.cont [8/16] (narrow) %v39_v10, 16  ;;  %2423 = vmatpush3.bf16.msra.mxu1 %v2422_v29  ;;  %v59_v59 = vld [vmem:[%s4271_s0 + $0xd8] sm:$0xff]  ;;  %v2464_v61 = vpack.c.bf16 %v244_v56, %v243_v55  ;;  %v60_v62 = vld [vmem:[%s4271_s0 + $0xe0] sm:$0xff]  ;;  %v61_v0 = vld [vmem:[%s4271_s0 + $0xe8] sm:$0xff] }
  0x20   :  { %2393 = vmatprep.subr.bf16.mxu0 %v2392_v30  ;;  %2425 = vmatprep.subr.bf16.mxu1 %v2424_v39  ;;  %v43_v60 = vld [vmem:[%s4271_s0 + $0x58] sm:$0xff]  ;;  %v44_v63 = vld [vmem:[%s4271_s0 + $0x60] sm:$0xff]  ;;  %v45_v1 = vld [vmem:[%s4271_s0 + $0x68] sm:$0xff] }
  0x21   :  { %v62_v2 = vld [vmem:[%s4271_s0 + $0xf0] sm:$0xff]  ;;  %v63_v4 = vld [vmem:[%s4271_s0 + $0xf8] sm:$0xff]  ;;  %v195_v10 = vld [vmem:[%s4272_s1 + $0x200] sm:$0xff] }
  0x22   :  { %104 = vxpose.xlu0.b32.cont [9/16] (narrow) %v56_v23, 16  ;;  %2395 = vmatpush3.bf16.msra.mxu0 %v2394_v40  ;;  %v46_v3 = vld [vmem:[%s4271_s0 + $0x70] sm:$0xff]  ;;  %v47_v5 = vld [vmem:[%s4271_s0 + $0x78] sm:$0xff]  ;;  %v196_v11 = vld [vmem:[%s4272_s1 + $0x208] sm:$0xff] }
  0x23   :  { %72 = vxpose.xlu1.b32.cont [9/16] (narrow) %v40_v24, 16  ;;  %2427 = vmatpush3.bf16.msra.mxu1 %v2426_v43  ;;  %v227_v16 = vld [vmem:[%s4272_s1 + $0x300] sm:$0xff]  ;;  %v228_v17 = vld [vmem:[%s4272_s1 + $0x308] sm:$0xff]  ;;  %v213_v20 = vld [vmem:[%s4272_s1 + $0x290] sm:$0xff]  ;;  %v2434_v28 = vpack.c.bf16 %v196_v11, %v195_v10 }
  0x24   :  { %2397 = vmatprep.subr.bf16.mxu0 %v2396_v44  ;;  %2429 = vmatprep.subr.bf16.mxu1 %v2428_v53  ;;  %v214_v21 = vld [vmem:[%s4272_s1 + $0x298] sm:$0xff]  ;;  %v245_v26 = vld [vmem:[%s4272_s1 + $0x390] sm:$0xff]  ;;  %v2466_v29 = vpack.c.bf16 %v228_v17, %v227_v16  ;;  %v215_v40 = vld [vmem:[%s4272_s1 + $0x2a0] sm:$0xff] }
  0x25   :  { %v246_v27 = vld [vmem:[%s4272_s1 + $0x398] sm:$0xff]  ;;  %v197_v32 = vld [vmem:[%s4272_s1 + $0x210] sm:$0xff]  ;;  %v2436_v41 = vpack.c.bf16 %v214_v21, %v213_v20  ;;  %v216_v45 = vld [vmem:[%s4272_s1 + $0x2a8] sm:$0xff] }
  0x26   :  { %105 = vxpose.xlu0.b32.cont [10/16] (narrow) %v57_v37, 16  ;;  %2399 = vmatpush3.bf16.msra.mxu0 %v2398_v54  ;;  %v198_v33 = vld [vmem:[%s4272_s1 + $0x218] sm:$0xff]  ;;  %v2468_v42 = vpack.c.bf16 %v246_v27, %v245_v26  ;;  %v247_v46 = vld [vmem:[%s4272_s1 + $0x3a0] sm:$0xff]  ;;  %v248_v47 = vld [vmem:[%s4272_s1 + $0x3a8] sm:$0xff]  ;;  %v2440_v56 = vpack.c.bf16 %v216_v45, %v215_v40 }
  0x27   :  { %73 = vxpose.xlu1.b32.cont [10/16] (narrow) %v41_v38, 16  ;;  %2431 = vmatpush3.bf16.msra.mxu1 %v2430_v57  ;;  %v229_v38 = vld [vmem:[%s4272_s1 + $0x310] sm:$0xff]  ;;  %v230_v39 = vld [vmem:[%s4272_s1 + $0x318] sm:$0xff]  ;;  %v2438_v48 = vpack.c.bf16 %v198_v33, %v197_v32  ;;  %v199_v49 = vld [vmem:[%s4272_s1 + $0x220] sm:$0xff]  ;;  %v2472_v57 = vpack.c.bf16 %v248_v47, %v247_v46 }
  0x28   :  { %2433 = vmatprep.subr.bf16.mxu0 %v2432_v58  ;;  %2465 = vmatprep.subr.bf16.mxu1 %v2464_v61  ;;  %v200_v53 = vld [vmem:[%s4272_s1 + $0x228] sm:$0xff]  ;;  %v231_v54 = vld [vmem:[%s4272_s1 + $0x320] sm:$0xff]  ;;  %v222_v45 = vld [vmem:[%s4272_s1 + $0x2d8] sm:$0xff] }
  0x29   :  { %v232_v55 = vld [vmem:[%s4272_s1 + $0x328] sm:$0xff]  ;;  %v219_v21 = vld [vmem:[%s4272_s1 + $0x2c0] sm:$0xff]  ;;  %v253_v46 = vld [vmem:[%s4272_s1 + $0x3d0] sm:$0xff] }
  0x2a   :  { %106 = vxpose.xlu0.b32.cont [11/16] (narrow) %v58_v51, 16  ;;  %v220_v26 = vld [vmem:[%s4272_s1 + $0x2c8] sm:$0xff]  ;;  %v254_v47 = vld [vmem:[%s4272_s1 + $0x3d8] sm:$0xff] }
  0x2b   :  { %74 = vxpose.xlu1.b32.cont [11/16] (narrow) %v42_v52, 16  ;;  %v2470_v52 = vpack.c.bf16 %v230_v39, %v229_v38  ;;  %v252_v32 = vld [vmem:[%s4272_s1 + $0x3c8] sm:$0xff]  ;;  %v203_v38 = vld [vmem:[%s4272_s1 + $0x240] sm:$0xff] }
  0x2c   :  { %v204_v39 = vld [vmem:[%s4272_s1 + $0x248] sm:$0xff] }
  0x2d   :  { %v236_v40 = vld [vmem:[%s4272_s1 + $0x348] sm:$0xff] }
  0x2e   :  { %107 = vxpose.xlu0.b32.cont [12/16] (narrow) %v59_v59, 16 }
  0x2f   :  { %75 = vxpose.xlu1.b32.cont [12/16] (narrow) %v43_v60, 16 }
  0x32   :  { %108 = vxpose.xlu0.b32.cont [13/16] (narrow) %v60_v62, 16  ;;  %v217_v62 = vld [vmem:[%s4272_s1 + $0x2b0] sm:$0xff] }
  0x33   :  { %76 = vxpose.xlu1.b32.cont [13/16] (narrow) %v44_v63, 16  ;;  %v218_v63 = vld [vmem:[%s4272_s1 + $0x2b8] sm:$0xff] }
  0x36   :  { %109 = vxpose.xlu0.b32.cont [14/16] (narrow) %v61_v0, 16  ;;  %v2442_v0 = vpack.c.bf16 %v200_v53, %v199_v49  ;;  %v2484_v53 = vpack.c.bf16 %v254_v47, %v253_v46 }
  0x37   :  { %77 = vxpose.xlu1.b32.cont [14/16] (narrow) %v45_v1, 16  ;;  %v2474_v1 = vpack.c.bf16 %v232_v55, %v231_v54  ;;  %v237_v54 = vld [vmem:[%s4272_s1 + $0x350] sm:$0xff]  ;;  %v238_v55 = vld [vmem:[%s4272_s1 + $0x358] sm:$0xff] }
  0x3a   :  { %110 = vxpose.xlu0.b32.cont [15/16] (narrow) %v62_v2, 16  ;;  %v249_v2 = vld [vmem:[%s4272_s1 + $0x3b0] sm:$0xff] }
  0x3b   :  { %78 = vxpose.xlu1.b32.cont [15/16] (narrow) %v46_v3, 16  ;;  %v250_v3 = vld [vmem:[%s4272_s1 + $0x3b8] sm:$0xff] }
  0x3c   :  { %v2476_v20 = vpack.c.bf16 %v250_v3, %v249_v2  ;;  %v239_v3 = vld [vmem:[%s4272_s1 + $0x360] sm:$0xff] }
  0x3e   :  { %111 = vxpose.xlu0.b32.end [16/16] (narrow) %v63_v4, 16  ;;  %v201_v4 = vld [vmem:[%s4272_s1 + $0x230] sm:$0xff] }
  0x3f   :  { %79 = vxpose.xlu1.b32.end [16/16] (narrow) %v47_v5, 16 }
  0x82   :  { %v3057_v8 = vpop.trf.xlu0 }
  0x83   :  { %v3059_v9 = vpop.trf.xlu1  ;;  %v299_v60 = vrot.slane %v3057_v8, 5  ;;  %v337_v61 = vrot.slane %v3057_v8, 7  ;;  %v280_v10 = vrot.slane %v3057_v8, 4  ;;  %v318_v11 = vrot.slane %v3057_v8, 6 }
  0x84   :  { %v297_v12 = vrot.slane %v3059_v9, 5  ;;  %v335_v13 = vrot.slane %v3059_v9, 7  ;;  %v278_v14 = vrot.slane %v3059_v9, 4  ;;  %v316_v15 = vrot.slane %v3059_v9, 6 }
  0x86   :  { %v3081_v18 = vpop.trf.xlu0 }
  0x87   :  { %v3083_v19 = vpop.trf.xlu1  ;;  %v300_v22 = vrot.slane %v3081_v18, 5  ;;  %v338_v23 = vrot.slane %v3081_v18, 7  ;;  %v281_v24 = vrot.slane %v3081_v18, 4  ;;  %v319_v25 = vrot.slane %v3081_v18, 6 }
  0x88   :  { %v298_v30 = vrot.slane %v3083_v19, 5  ;;  %v336_v31 = vrot.slane %v3083_v19, 7  ;;  %v279_v43 = vrot.slane %v3083_v19, 4  ;;  %v317_v44 = vrot.slane %v3083_v19, 6 }
  0x89   :  { %v305_v34 = vsel %vm301_vm0, %v300_v22, %v297_v12  ;;  %v343_v35 = vsel %vm339_vm2, %v338_v23, %v335_v13  ;;  %v3125_v36 = vsel %vm282_vm3, %v281_v24, %v278_v14  ;;  %v324_v37 = vsel %vm320_vm6, %v319_v25, %v316_v15 }
  0x8a   :  { %1863 = vmatprep.mubr.msk.f32.mxu0 %vm306_vm1, %v305_v34  ;;  %1867 = vmatprep.mubr.msk.f32.mxu1 %vm344_vm4, %v343_v35  ;;  %v304_v50 = vsel %vm301_vm0, %v297_v12, %v298_v30  ;;  %v342_v51 = vsel %vm339_vm2, %v335_v13, %v336_v31  ;;  %v3178_v58 = vsel %vm282_vm3, %v278_v14, %v279_v43  ;;  %v202_v12 = vld [vmem:[%s4272_s1 + $0x238] sm:$0xff]  ;;  %v233_v13 = vld [vmem:[%s4272_s1 + $0x330] sm:$0xff]  ;;  %v365_v35 = vrot.slane %v3083_v19, 1 }
  0x8b   :  { %1864 = vmatmul.mubr.msk.f32.vlgmr.msra.gmra.mrb[0].mxu0 %vm287_vm5, %v3125_v36  ;;  %1868 = vmatmul.mubr.msk.f32.vlgmr.msra.gmra.mrb[0].mxu1 %vm325_vm7, %v324_v37  ;;  %v323_v59 = vsel %vm320_vm6, %v316_v15, %v317_v44  ;;  %v303_v5 = vsel %vm301_vm0, %v298_v30, %v299_v60  ;;  %v341_v6 = vsel %vm339_vm2, %v336_v31, %v337_v61  ;;  %v234_v14 = vld [vmem:[%s4272_s1 + $0x338] sm:$0xff]  ;;  %v402_v30 = vrot.slane %v3059_v9, 3  ;;  %v251_v31 = vld [vmem:[%s4272_s1 + $0x3c0] sm:$0xff] }
  0x8c   :  { %2435 = vmatpush3.bf16.msra.mxu0 %v2434_v28  ;;  %2467 = vmatpush3.bf16.msra.mxu1 %v2466_v29  ;;  %v2444_v15 = vpack.c.bf16 %v218_v63, %v217_v62  ;;  %v3221_v16 = vsel %vm282_vm3, %v279_v43, %v280_v10  ;;  %v322_v17 = vsel %vm320_vm6, %v317_v44, %v318_v11  ;;  %v364_v29 = vrot.slane %v3059_v9, 1  ;;  %v207_v63 = vld [vmem:[%s4272_s1 + $0x260] sm:$0xff] }
  0x8d   :  { %506 = vmatprep.mubr.f32.mxu0 %v304_v50  ;;  %591 = vmatprep.mubr.f32.mxu1 %v342_v51  ;;  %v2446_v27 = vpack.c.bf16 %v202_v12, %v201_v4  ;;  %v2478_v28 = vpack.c.bf16 %v234_v14, %v233_v13  ;;  %v302_v33 = vsel %vm301_vm0, %v299_v60, %v300_v22  ;;  %v403_v37 = vrot.slane %v3083_v19, 3  ;;  %v205_v50 = vld [vmem:[%s4272_s1 + $0x250] sm:$0xff]  ;;  %v206_v51 = vld [vmem:[%s4272_s1 + $0x258] sm:$0xff]  ;;  %v256_v60 = vld [vmem:[%s4272_s1 + $0x3e8] sm:$0xff] }
  0x8e   :  { %2437 = vmatprep.subr.bf16.mxu0 %v2436_v41  ;;  %2469 = vmatprep.subr.bf16.mxu1 %v2468_v42  ;;  %v340_v34 = vsel %vm339_vm2, %v337_v61, %v338_v23  ;;  %v2448_v22 = vpack.c.bf16 %v220_v26, %v219_v21  ;;  %v235_v23 = vld [vmem:[%s4272_s1 + $0x340] sm:$0xff]  ;;  %v221_v41 = vld [vmem:[%s4272_s1 + $0x2d0] sm:$0xff]  ;;  %v3275_v42 = vsel %vm282_vm3, %v280_v10, %v281_v24  ;;  %v240_v4 = vld [vmem:[%s4272_s1 + $0x368] sm:$0xff]  ;;  %v367_v47 = vrot.slane %v3081_v18, 1 }
  0x8f   :  { %507 = vmatmul.mubr.f32.gmra.mrb[2].mxu0 %v3178_v58  ;;  %592 = vmatmul.mubr.f32.gmra.mrb[2].mxu1 %v323_v59  ;;  %v321_v43 = vsel %vm320_vm6, %v318_v11, %v319_v25  ;;  %v2480_v44 = vpack.c.bf16 %v252_v32, %v251_v31  ;;  %v2450_v24 = vpack.c.bf16 %v204_v39, %v203_v38  ;;  %v255_v59 = vld [vmem:[%s4272_s1 + $0x3e0] sm:$0xff]  ;;  %v257_v10 = vld [vmem:[%s4272_s1 + $0x3f0] sm:$0xff]  ;;  %v258_v11 = vld [vmem:[%s4272_s1 + $0x3f8] sm:$0xff]  ;;  %v383_v38 = vrot.slane %v3059_v9, 2 }
  0x90   :  { %2439 = vmatpush3.bf16.msra.mxu0 %v2438_v48  ;;  %2471 = vmatpush3.bf16.msra.mxu1 %v2470_v52  ;;  %v371_v25 = vsel %vm368_vm8, %v364_v29, %v365_v35  ;;  %v409_v48 = vsel %vm406_vm9, %v402_v30, %v403_v37  ;;  %v2482_v49 = vpack.c.bf16 %v236_v40, %v235_v23  ;;  %v209_v14 = vld [vmem:[%s4272_s1 + $0x270] sm:$0xff]  ;;  %v242_v26 = vld [vmem:[%s4272_s1 + $0x378] sm:$0xff]  ;;  %v384_v39 = vrot.slane %v3083_v19, 2 }
  0x91   :  { %1865 = vmatprep.mubr.msk.f32.mxu0 %vm306_vm1, %v303_v5  ;;  %1869 = vmatprep.mubr.msk.f32.mxu1 %vm344_vm4, %v341_v6  ;;  %v2452_v52 = vpack.c.bf16 %v222_v45, %v221_v41  ;;  %v2454_v61 = vpack.c.bf16 %v206_v51, %v205_v50  ;;  %v2486_v62 = vpack.c.bf16 %v238_v55, %v237_v54  ;;  %v225_v5 = vld [vmem:[%s4272_s1 + $0x2f0] sm:$0xff]  ;;  %v226_v6 = vld [vmem:[%s4272_s1 + $0x2f8] sm:$0xff]  ;;  %v366_v40 = vrot.slane %v3057_v8, 1 }
  0x92   :  { %2441 = vmatprep.subr.bf16.mxu0 %v2440_v56  ;;  %2473 = vmatprep.subr.bf16.mxu1 %v2472_v57  ;;  %v223_v56 = vld [vmem:[%s4272_s1 + $0x2e0] sm:$0xff]  ;;  %v224_v57 = vld [vmem:[%s4272_s1 + $0x2e8] sm:$0xff]  ;;  %v2488_v2 = vpack.c.bf16 %v256_v60, %v255_v59  ;;  %v2490_v13 = vpack.c.bf16 %v240_v4, %v239_v3  ;;  %v241_v21 = vld [vmem:[%s4272_s1 + $0x370] sm:$0xff]  ;;  %v404_v41 = vrot.slane %v3057_v8, 3 }
  0x93   :  { %1866 = vmatmul.mubr.msk.f32.gmra.mrb[4].mxu0 %vm287_vm5, %v3221_v16  ;;  %1870 = vmatmul.mubr.msk.f32.gmra.mrb[4].mxu1 %vm325_vm7, %v322_v17  ;;  %v2492_v17 = vpack.c.bf16 %v258_v11, %v257_v10  ;;  %v2494_v32 = vpack.c.bf16 %v242_v26, %v241_v21  ;;  %v262_v23 = vld [vmem:[%s4272_s1 + $0x418] sm:$0xff]  ;;  %v370_v45 = vsel %vm368_vm8, %v365_v35, %v366_v40  ;;  %v385_v35 = vrot.slane %v3057_v8, 2  ;;  %v267_v60 = vld [vmem:[%s4272_s1 + $0x440] sm:$0xff]  ;;  %v273_v4 = vld [vmem:[%s4272_s1 + $0x470] sm:$0xff] }
  0x94   :  { %2443 = vmatpush3.bf16.msra.mxu0 %v2442_v0  ;;  %2475 = vmatpush3.bf16.msra.mxu1 %v2474_v1  ;;  %v208_v0 = vld [vmem:[%s4272_s1 + $0x268] sm:$0xff]  ;;  %v2456_v1 = vpack.c.bf16 %v224_v57, %v223_v56  ;;  %v408_v46 = vsel %vm406_vm9, %v403_v37, %v404_v41  ;;  %v369_v51 = vsel %vm368_vm8, %v366_v40, %v367_v47  ;;  %v266_v54 = vld [vmem:[%s4272_s1 + $0x438] sm:$0xff]  ;;  %v1862_v11 = vld [vmem:[%s4273_s2] ss:$0 sm:$0xff] }
  0x95   :  { %516 = vmatprep.mubr.f32.mxu0 %v302_v33  ;;  %601 = vmatprep.mubr.f32.mxu1 %v340_v34  ;;  %v2458_v12 = vpack.c.bf16 %v208_v0, %v207_v63  ;;  %v3370_v34 = vadd.s32 8, %v3055_v7  ;;  %v389_v37 = vsel %vm387_vm10, %v384_v39, %v385_v35  ;;  %v372_v57 = vsel %vm368_vm8, %v367_v47, %v364_v29  ;;  %v270_v63 = vld [vmem:[%s4272_s1 + $0x458] sm:$0xff] }
  0x96   :  { %2445 = vmatprep.subr.bf16.mxu0 %v2444_v15  ;;  %2477 = vmatprep.subr.bf16.mxu1 %v2476_v20  ;;  %v2460_v15 = vpack.c.bf16 %v226_v6, %v225_v5  ;;  %v210_v20 = vld [vmem:[%s4272_s1 + $0x278] sm:$0xff] }
  0x97   :  { %517 = vmatmul.mubr.f32.gmra.mrb[6].mxu0 %v3275_v42  ;;  %602 = vmatmul.mubr.f32.gmra.mrb[6].mxu1 %v321_v43  ;;  %v2462_v31 = vpack.c.bf16 %v210_v20, %v209_v14  ;;  %vm376_vm11 = vcmp.lt.s32.totalorder %v3370_v34, 15  ;;  %vm414_vm12 = vcmp.lt.s32.totalorder %v3370_v34, 13  ;;  %v390_v43 = vsel %vm387_vm10, %v383_v38, %v384_v39 }
  0x98   :  { %2447 = vmatpush3.bf16.msra.mxu0 %v2446_v27  ;;  %2479 = vmatpush3.bf16.msra.mxu1 %v2478_v28  ;;  %v259_v27 = vld [vmem:[%s4272_s1 + $0x400] sm:$0xff]  ;;  %v260_v28 = vld [vmem:[%s4272_s1 + $0x408] sm:$0xff]  ;;  %vm395_vm13 = vcmp.lt.s32.totalorder %v3370_v34, 14  ;;  %vm424_vm14 = vcmp.lt.s32.totalorder %v3370_v34, 12 }
  0x99   :  { %671 = vmatprep.mubr.f32.mxu0 %v371_v25  ;;  %756 = vmatprep.mubr.f32.mxu1 %v409_v48  ;;  %v2496_v33 = vpack.c.bf16 %v260_v28, %v259_v27  ;;  %v263_v25 = vld [vmem:[%s4272_s1 + $0x420] sm:$0xff]  ;;  %v264_v48 = vld [vmem:[%s4272_s1 + $0x428] sm:$0xff] }
  0x9a   :  { %2449 = vmatprep.subr.bf16.mxu0 %v2448_v22  ;;  %2481 = vmatprep.subr.bf16.mxu1 %v2480_v44  ;;  %v261_v22 = vld [vmem:[%s4272_s1 + $0x410] sm:$0xff]  ;;  %v2504_v50 = vpack.c.bf16 %v264_v48, %v263_v25 }
  0x9b   :  { %v2500_v44 = vpack.c.bf16 %v262_v23, %v261_v22 }
  0x9c   :  { %2451 = vmatpush3.bf16.msra.mxu0 %v2450_v24  ;;  %2483 = vmatpush3.bf16.msra.mxu1 %v2482_v49  ;;  %v405_v24 = vrot.slane %v3081_v18, 3  ;;  %v386_v49 = vrot.slane %v3081_v18, 2 }
  0x9d   :  { %2453 = vmatprep.subr.bf16.mxu0 %v2452_v52  ;;  %2485 = vmatprep.subr.bf16.mxu1 %v2484_v53  ;;  %v265_v53 = vld [vmem:[%s4272_s1 + $0x430] sm:$0xff] }
  0x9e   :  { %v407_v52 = vsel %vm406_vm9, %v404_v41, %v405_v24  ;;  %v388_v55 = vsel %vm387_vm10, %v385_v35, %v386_v49  ;;  %v2508_v56 = vpack.c.bf16 %v266_v54, %v265_v53  ;;  %v410_v59 = vsel %vm406_vm9, %v405_v24, %v402_v30 }
  0x9f   :  { %v391_v29 = vsel %vm387_vm10, %v386_v49, %v383_v38 }
  0xa0   :  { %2455 = vmatpush3.bf16.msra.mxu0 %v2454_v61  ;;  %2487 = vmatpush3.bf16.msra.mxu1 %v2486_v62  ;;  %v268_v61 = vld [vmem:[%s4272_s1 + $0x448] sm:$0xff]  ;;  %v269_v62 = vld [vmem:[%s4272_s1 + $0x450] sm:$0xff] }
  0xa1   :  { %2457 = vmatprep.subr.bf16.mxu0 %v2456_v1  ;;  %2489 = vmatprep.subr.bf16.mxu1 %v2488_v2  ;;  %v2512_v30 = vpack.c.bf16 %v268_v61, %v267_v60  ;;  %v2516_v0 = vpack.c.bf16 %v270_v63, %v269_v62  ;;  %v271_v1 = vld [vmem:[%s4272_s1 + $0x460] sm:$0xff]  ;;  %v272_v2 = vld [vmem:[%s4272_s1 + $0x468] sm:$0xff] }
  0xa2   :  { %v2520_v3 = vpack.c.bf16 %v272_v2, %v271_v1 }
  0xa4   :  { %2459 = vmatpush3.bf16.msra.mxu0 %v2458_v12  ;;  %2491 = vmatpush3.bf16.msra.mxu1 %v2490_v13 }
  0xa5   :  { %2461 = vmatprep.subr.bf16.mxu0 %v2460_v15  ;;  %2493 = vmatprep.subr.bf16.mxu1 %v2492_v17 }
  0xa8   :  { %2463 = vmatpush3.bf16.msra.mxu0 %v2462_v31  ;;  %2495 = vmatpush3.bf16.msra.mxu1 %v2494_v32 }
  0xa9   :  { %2497 = vmatprep.subr.bf16.mxu0 %v2496_v33 }
  0xab   :  { %672 = vmatmul.mubr.f32.vlgmr.msra.gmra.mrb[8].mxu0 %v3059_v9  ;;  %757 = vmatmul.mubr.f32.vlgmr.msra.gmra.mrb[8].mxu1 %v390_v43 }
  0xac   :  { %1871 = vmatprep.mubr.msk.f32.mxu0 %vm376_vm11, %v370_v45  ;;  %1873 = vmatprep.mubr.msk.f32.mxu1 %vm414_vm12, %v408_v46 }
  0xad   :  { %2499 = vmatpush3.bf16.msra.mxu0 %v2496_v33 }
  0xae   :  { %2501 = vmatprep.subr.bf16.mxu0 %v2500_v44 }
  0xaf   :  { %677 = vmatmul.mubr.f32.gmra.mrb[10].mxu0 %v3083_v19  ;;  %1874 = vmatmul.mubr.msk.f32.gmra.mrb[10].mxu1 %vm395_vm13, %v389_v37 }
  0xb0   :  { %681 = vmatprep.mubr.f32.mxu0 %v369_v51  ;;  %766 = vmatprep.mubr.f32.mxu1 %v407_v52 }
  0xb1   :  { %2503 = vmatpush3.bf16.msra.mxu0 %v2500_v44 }
  0xb2   :  { %2505 = vmatprep.subr.bf16.mxu0 %v2504_v50 }
  0xb3   :  { %682 = vmatmul.mubr.f32.gmra.mrb[12].mxu0 %v3057_v8  ;;  %767 = vmatmul.mubr.f32.gmra.mrb[12].mxu1 %v388_v55 }
  0xb4   :  { %1872 = vmatprep.mubr.msk.f32.mxu0 %vm376_vm11, %v372_v57  ;;  %1875 = vmatprep.mubr.msk.f32.mxu1 %vm414_vm12, %v410_v59 }
  0xb5   :  { %2507 = vmatpush3.bf16.msra.mxu0 %v2504_v50 }
  0xb6   :  { %2509 = vmatprep.subr.bf16.mxu0 %v2508_v56 }
  0xb7   :  { %687 = vmatmul.mubr.f32.gmra.mrb[14].mxu0 %v3081_v18  ;;  %1876 = vmatmul.mubr.msk.f32.gmra.mrb[14].mxu1 %vm395_vm13, %v391_v29 }
  0xb8   :  { %2324 = vmatprep.mubr.f32.mxu0 %v3178_v58  ;;  %v274_v58 = vld [vmem:[%s4272_s1 + $0x478] sm:$0xff] }
  0xb9   :  { %2511 = vmatpush3.bf16.msra.mxu0 %v2508_v56  ;;  %v2524_v5 = vpack.c.bf16 %v274_v58, %v273_v4 }
  0xba   :  { %2513 = vmatprep.subr.bf16.mxu0 %v2512_v30 }
  0xbd   :  { %2515 = vmatpush3.bf16.msra.mxu0 %v2512_v30 }
  0xbe   :  { %2517 = vmatprep.subr.bf16.mxu0 %v2516_v0 }
  0xc1   :  { %2519 = vmatpush3.bf16.msra.mxu0 %v2516_v0 }
  0xc2   :  { %2521 = vmatprep.subr.bf16.mxu0 %v2520_v3 }
  0xc5   :  { %2523 = vmatpush3.bf16.msra.mxu0 %v2520_v3 }
  0xc6   :  { %2525 = vmatprep.subr.bf16.mxu0 %v2524_v5 }
  0xc9   :  { %2527 = vmatpush3.bf16.msra.mxu0 %v2524_v5 }
  0xcc   :  { %2325 = vmatmul.mubr.msk.f32.vlgmr.msra.gmra.mrb[16].mxu0 %vm424_vm14, %v3221_v16 }
  0xcd   :  { %2327 = vmatprep.mubr.f32.mxu0 %v3275_v42 }
  0xd0   :  { %2328 = vmatmul.mubr.msk.f32.gmra.mrb[18].mxu0 %vm424_vm14, %v3125_v36 }
 0x15e   :  { %v1932_v6 = vpop.f32.mrb[0].mxu0  ;;  %v1976_v10 = vpop.f32.mrb[0].mxu1 }
 0x15f   :  { %v1933_v12 = vpop.f32.mrb[1].mxu0  ;;  %v1977_v13 = vpop.f32.mrb[1].mxu1 }
 0x160   :  { %v1934_v14 = vadd.f32 %v1933_v12, %v1932_v6  ;;  %v1978_v15 = vadd.f32 %v1977_v13, %v1976_v10 }
 0x162   :  { %v504_v17 = vadd.f32 %v1934_v14, %v1862_v11  ;;  %v1935_v20 = vpop.f32.mrb[2].mxu0  ;;  %v1979_v21 = vpop.f32.mrb[2].mxu1 }
 0x163   :  { %v1936_v16 = vpop.f32.mrb[3].mxu0  ;;  %v1980_v26 = vpop.f32.mrb[3].mxu1 }
 0x164   :  { %v589_v42 = vadd.f32 %v1978_v15, %v504_v17  ;;  %v1937_v27 = vadd.f32 %v1936_v16, %v1935_v20  ;;  %v1981_v28 = vadd.f32 %v1980_v26, %v1979_v21 }
 0x166   :  { %v509_v31 = vadd.f32 %v1937_v27, %v1862_v11  ;;  %v1938_v36 = vpop.f32.mrb[4].mxu0  ;;  %v1982_v32 = vpop.f32.mrb[4].mxu1 }
 0x167   :  { %v1939_v33 = vpop.f32.mrb[5].mxu0  ;;  %v1983_v38 = vpop.f32.mrb[5].mxu1 }
 0x168   :  { %v594_v39 = vadd.f32 %v1981_v28, %v509_v31  ;;  %v1940_v22 = vadd.f32 %v1939_v33, %v1938_v36  ;;  %v1984_v23 = vadd.f32 %v1983_v38, %v1982_v32  ;;  %v947_v31 = vld [vmem:[%s4274_s5 + $0x80] sm:$0xff]  ;;  %v948_v36 = vld [vmem:[%s4274_s5 + $0x88] sm:$0xff] }
 0x169   :  { %v979_v32 = vld [vmem:[%s4274_s5 + $0x180] sm:$0xff]  ;;  %v2528_v33 = vpack.c.bf16 %v948_v36, %v947_v31  ;;  %v980_v38 = vld [vmem:[%s4274_s5 + $0x188] sm:$0xff]  ;;  %v938_v31 = vld [vmem:[%s4274_s5 + $0x38] sm:$0xff] }
 0x16a   :  { %v514_v40 = vadd.f32 %v1940_v22, %v1862_v11  ;;  %v1941_v41 = vpop.f32.mrb[6].mxu0  ;;  %v1985_v43 = vpop.f32.mrb[6].mxu1  ;;  %v932_v22 = vld [vmem:[%s4274_s5 + $0x8] sm:$0xff] }
 0x16b   :  { %v1942_v44 = vpop.f32.mrb[7].mxu0  ;;  %v1986_v45 = vpop.f32.mrb[7].mxu1  ;;  %2529 = vmatprep.subr.bf16.mxu1 %v2528_v33  ;;  %v969_v33 = vld [vmem:[%s4274_s5 + $0x130] sm:$0xff] }
 0x16c   :  { %v599_v46 = vadd.f32 %v1984_v23, %v514_v40  ;;  %v1943_v47 = vadd.f32 %v1942_v44, %v1941_v41  ;;  %v1987_v24 = vadd.f32 %v1986_v45, %v1985_v43  ;;  %v2560_v23 = vpack.c.bf16 %v980_v38, %v979_v32  ;;  %v963_v41 = vld [vmem:[%s4274_s5 + $0x100] sm:$0xff]  ;;  %v964_v43 = vld [vmem:[%s4274_s5 + $0x108] sm:$0xff]  ;;  %v970_v38 = vld [vmem:[%s4274_s5 + $0x138] sm:$0xff] }
 0x16d   :  { %v2562_v44 = vpack.c.bf16 %v964_v43, %v963_v41  ;;  %v988_v43 = vld [vmem:[%s4274_s5 + $0x1c8] sm:$0xff] }
 0x16e   :  { %v519_v25 = vadd.f32 %v1943_v47, %v1862_v11  ;;  %2561 = vmatprep.subr.bf16.mxu0 %v2560_v23  ;;  %v956_v23 = vld [vmem:[%s4274_s5 + $0xc8] sm:$0xff] }
 0x16f   :  { %2563 = vmatpush3.bf16.msra.mxu0 %v2562_v44  ;;  %v939_v44 = vld [vmem:[%s4274_s5 + $0x40] sm:$0xff] }
 0x170   :  { %v604_v48 = vadd.f32 %v1987_v24, %v519_v25 }
 0x17e   :  { %v2020_v35 = vpop.f32.mrb[8].mxu0  ;;  %v2064_v37 = vpop.f32.mrb[8].mxu1 }
 0x17f   :  { %v2021_v49 = vpop.f32.mrb[9].mxu0  ;;  %v2065_v50 = vpop.f32.mrb[9].mxu1 }
 0x180   :  { %v2022_v51 = vadd.f32 %v2021_v49, %v2020_v35  ;;  %v2066_v52 = vadd.f32 %v2065_v50, %v2064_v37 }
 0x182   :  { %v674_v53 = vadd.f32 %v2022_v51, %v589_v42  ;;  %v2023_v54 = vpop.f32.mrb[10].mxu0  ;;  %v2067_v55 = vpop.f32.mrb[10].mxu1 }
 0x183   :  { %v2024_v56 = vpop.f32.mrb[11].mxu0  ;;  %v2068_v57 = vpop.f32.mrb[11].mxu1 }
 0x184   :  { %v2025_v59 = vadd.f32 %v2024_v56, %v2023_v54  ;;  %v2069_v60 = vadd.f32 %v2068_v57, %v2067_v55  ;;  %v759_v61 = vadd.f32 %v2066_v52, %v674_v53  ;;  %v949_v57 = vld [vmem:[%s4274_s5 + $0x90] sm:$0xff] }
 0x186   :  { %v679_v29 = vadd.f32 %v2025_v59, %v594_v39  ;;  %v2026_v30 = vpop.f32.mrb[12].mxu0  ;;  %v2070_v62 = vpop.f32.mrb[12].mxu1  ;;  %v931_v39 = vld [vmem:[%s4274_s5] sm:$0xff]  ;;  %v950_v59 = vld [vmem:[%s4274_s5 + $0x98] sm:$0xff] }
 0x187   :  { %v2027_v63 = vpop.f32.mrb[13].mxu0  ;;  %v2071_v0 = vpop.f32.mrb[13].mxu1  ;;  %v2530_v40 = vpack.c.bf16 %v932_v22, %v931_v39  ;;  %v2574_v39 = vpack.c.bf16 %v970_v38, %v969_v33  ;;  %v955_v22 = vld [vmem:[%s4274_s5 + $0xc0] sm:$0xff]  ;;  %v1044_v38 = vld [vmem:[%s4274_s5 + $0x388] sm:$0xff] }
 0x188   :  { %v2028_v1 = vadd.f32 %v2027_v63, %v2026_v30  ;;  %v2072_v2 = vadd.f32 %v2071_v0, %v2070_v62  ;;  %v764_v3 = vadd.f32 %v2069_v60, %v679_v29  ;;  %v981_v60 = vld [vmem:[%s4274_s5 + $0x190] sm:$0xff]  ;;  %v982_v29 = vld [vmem:[%s4274_s5 + $0x198] sm:$0xff]  ;;  %v2544_v41 = vpack.c.bf16 %v956_v23, %v955_v22 }
 0x189   :  { %2531 = vmatpush3.bf16.msra.mxu1 %v2530_v40  ;;  %v933_v30 = vld [vmem:[%s4274_s5 + $0x10] sm:$0xff]  ;;  %v934_v62 = vld [vmem:[%s4274_s5 + $0x18] sm:$0xff]  ;;  %v2564_v63 = vpack.c.bf16 %v982_v29, %v981_v60  ;;  %v987_v40 = vld [vmem:[%s4274_s5 + $0x1c0] sm:$0xff] }
 0x18a   :  { %v684_v4 = vadd.f32 %v2028_v1, %v599_v46  ;;  %v2029_v58 = vpop.f32.mrb[14].mxu0  ;;  %v2073_v5 = vpop.f32.mrb[14].mxu1  ;;  %v2534_v0 = vpack.c.bf16 %v934_v62, %v933_v30  ;;  %v965_v1 = vld [vmem:[%s4274_s5 + $0x110] sm:$0xff]  ;;  %v974_v29 = vld [vmem:[%s4274_s5 + $0x158] sm:$0xff]  ;;  %v959_v62 = vld [vmem:[%s4274_s5 + $0xe0] sm:$0xff] }
 0x18b   :  { %v2030_v6 = vpop.f32.mrb[15].mxu0  ;;  %v2074_v10 = vpop.f32.mrb[15].mxu1  ;;  %2565 = vmatprep.subr.bf16.mxu0 %v2564_v63  ;;  %v960_v63 = vld [vmem:[%s4274_s5 + $0xe8] sm:$0xff] }
 0x18c   :  { %v2031_v11 = vadd.f32 %v2030_v6, %v2029_v58  ;;  %v2075_v12 = vadd.f32 %v2074_v10, %v2073_v5  ;;  %v769_v13 = vadd.f32 %v2072_v2, %v684_v4  ;;  %v966_v2 = vld [vmem:[%s4274_s5 + $0x118] sm:$0xff]  ;;  %v951_v4 = vld [vmem:[%s4274_s5 + $0xa0] sm:$0xff]  ;;  %v952_v58 = vld [vmem:[%s4274_s5 + $0xa8] sm:$0xff] }
 0x18d   :  { %v983_v5 = vld [vmem:[%s4274_s5 + $0x1a0] sm:$0xff]  ;;  %v2536_v6 = vpack.c.bf16 %v952_v58, %v951_v4  ;;  %v984_v10 = vld [vmem:[%s4274_s5 + $0x1a8] sm:$0xff] }
 0x18e   :  { %v689_v14 = vadd.f32 %v2031_v11, %v604_v48  ;;  %v935_v11 = vld [vmem:[%s4274_s5 + $0x20] sm:$0xff]  ;;  %v944_v4 = vld [vmem:[%s4274_s5 + $0x68] sm:$0xff] }
 0x190   :  { %v774_v15 = vadd.f32 %v2075_v12, %v689_v14  ;;  %v936_v12 = vld [vmem:[%s4274_s5 + $0x28] sm:$0xff] }
 0x191   :  { %v2538_v14 = vpack.c.bf16 %v936_v12, %v935_v11  ;;  %v961_v12 = vld [vmem:[%s4274_s5 + $0xf0] sm:$0xff] }
 0x19f   :  { %v2326_v17 = vpop.f32.mrb[16].mxu0 }
 0x1a0   :  { %v849_v20 = vadd.f32 %v2326_v17, %v764_v3  ;;  %v843_v21 = vpop.f32.mrb[17].mxu0  ;;  %v2566_v3 = vpack.c.bf16 %v966_v2, %v965_v1  ;;  %v968_v17 = vld [vmem:[%s4274_s5 + $0x128] sm:$0xff]  ;;  %v2552_v1 = vpack.c.bf16 %v960_v63, %v959_v62  ;;  %v1027_v62 = vld [vmem:[%s4274_s5 + $0x300] sm:$0xff]  ;;  %v1013_v63 = vld [vmem:[%s4274_s5 + $0x290] sm:$0xff] }
 0x1a1   :  { %v844_v16 = vadd.f32 %v843_v21, %v759_v61  ;;  %v2532_v61 = vpack.c.bf16 %v950_v59, %v949_v57  ;;  %v953_v21 = vld [vmem:[%s4274_s5 + $0xb0] sm:$0xff]  ;;  %v942_v57 = vld [vmem:[%s4274_s5 + $0x58] sm:$0xff]  ;;  %v992_v2 = vld [vmem:[%s4274_s5 + $0x1e8] sm:$0xff] }
 0x1a2   :  { %2567 = vmatpush3.bf16.msra.mxu0 %v2566_v3  ;;  %v943_v3 = vld [vmem:[%s4274_s5 + $0x60] sm:$0xff] }
 0x1a3   :  { %v2329_v26 = vpop.f32.mrb[18].mxu0  ;;  %862 = vadd.xlane.f32.xlu0 %v844_v16  ;;  %2533 = vmatprep.subr.bf16.mxu1 %v2532_v61  ;;  %v973_v61 = vld [vmem:[%s4274_s5 + $0x150] sm:$0xff] }
 0x1a4   :  { %v859_v42 = vadd.f32 %v2329_v26, %v774_v15  ;;  %v853_v27 = vpop.f32.mrb[19].mxu0  ;;  %2535 = vmatpush3.bf16.msra.mxu1 %v2534_v0  ;;  %v967_v15 = vld [vmem:[%s4274_s5 + $0x120] sm:$0xff]  ;;  %v985_v26 = vld [vmem:[%s4274_s5 + $0x1b0] sm:$0xff]  ;;  %v2582_v30 = vpack.c.bf16 %v974_v29, %v973_v61  ;;  %v996_v29 = vld [vmem:[%s4274_s5 + $0x208] sm:$0xff] }
 0x1a5   :  { %v854_v28 = vadd.f32 %v853_v27, %v769_v13  ;;  %v2568_v13 = vpack.c.bf16 %v984_v10, %v983_v5  ;;  %2537 = vmatprep.subr.bf16.mxu1 %v2536_v6  ;;  %v986_v27 = vld [vmem:[%s4274_s5 + $0x1b8] sm:$0xff]  ;;  %v991_v0 = vld [vmem:[%s4274_s5 + $0x1e0] sm:$0xff]  ;;  %v2554_v5 = vpack.c.bf16 %v944_v4, %v943_v3  ;;  %v976_v10 = vld [vmem:[%s4274_s5 + $0x168] sm:$0xff] }
 0x1a6   :  { %868 = vadd.xlane.f32.xlu1 %v859_v42  ;;  %v2572_v36 = vpack.c.bf16 %v986_v27, %v985_v26  ;;  %v2584_v58 = vpack.c.bf16 %v992_v2, %v991_v0  ;;  %v975_v6 = vld [vmem:[%s4274_s5 + $0x160] sm:$0xff]  ;;  %v978_v27 = vld [vmem:[%s4274_s5 + $0x178] sm:$0xff]  ;;  %v1045_v3 = vld [vmem:[%s4274_s5 + $0x390] sm:$0xff] }
 0x1a7   :  { %2569 = vmatprep.subr.bf16.mxu0 %v2568_v13  ;;  %v2586_v11 = vpack.c.bf16 %v976_v10, %v975_v6  ;;  %v962_v13 = vld [vmem:[%s4274_s5 + $0xf8] sm:$0xff]  ;;  %v995_v61 = vld [vmem:[%s4274_s5 + $0x200] sm:$0xff] }
 0x1a8   :  { %2539 = vmatpush3.bf16.msra.mxu1 %v2538_v14  ;;  %v993_v14 = vld [vmem:[%s4274_s5 + $0x1f0] sm:$0xff]  ;;  %v1014_v2 = vld [vmem:[%s4274_s5 + $0x298] sm:$0xff]  ;;  %v2594_v6 = vpack.c.bf16 %v996_v29, %v995_v61  ;;  %v1031_v61 = vld [vmem:[%s4274_s5 + $0x320] sm:$0xff] }
 0x1a9   :  { %v1046_v4 = vld [vmem:[%s4274_s5 + $0x398] sm:$0xff]  ;;  %v1032_v29 = vld [vmem:[%s4274_s5 + $0x328] sm:$0xff] }
 0x1aa   :  { %864 = vadd.xlane.f32.xlu1 %v849_v20 }
 0x1ae   :  { %866 = vadd.xlane.f32.xlu1 %v854_v28 }
 0x230   :  { %v863_v45 = vpop.xlane.xlu0 %862 }
 0x231   :  { %v871_v46 = vmul.f32 0.0078125, %v863_v45  ;;  %v940_v45 = vld [vmem:[%s4274_s5 + $0x48] sm:$0xff] }
 0x233   :  { %v3506_v47 = vsub.f32 %v844_v16, %v871_v46  ;;  %v869_v24 = vpop.xlane.xlu1 %868  ;;  %v954_v16 = vld [vmem:[%s4274_s5 + $0xb8] sm:$0xff]  ;;  %v2576_v46 = vpack.c.bf16 %v988_v43, %v987_v40 }
 0x234   :  { %v874_v25 = vmul.f32 0.0078125, %v869_v24  ;;  %v2546_v24 = vpack.c.bf16 %v940_v45, %v939_v44 }
 0x235   :  { %v879_v48 = vmul.f32 %v3506_v47, %v3506_v47 }
 0x236   :  { %v3510_v35 = vsub.f32 %v859_v42, %v874_v25  ;;  %v2540_v42 = vpack.c.bf16 %v954_v16, %v953_v21  ;;  %v971_v25 = vld [vmem:[%s4274_s5 + $0x140] sm:$0xff]  ;;  %v946_v21 = vld [vmem:[%s4274_s5 + $0x78] sm:$0xff] }
 0x237   :  { %883 = vadd.xlane.f32.xlu0 %v879_v48  ;;  %v865_v37 = vpop.xlane.xlu1 %864  ;;  %v972_v48 = vld [vmem:[%s4274_s5 + $0x148] sm:$0xff] }
 0x238   :  { %v872_v49 = vmul.f32 0.0078125, %v865_v37  ;;  %v882_v50 = vmul.f32 %v3510_v35, %v3510_v35  ;;  %2541 = vmatprep.subr.bf16.mxu1 %v2540_v42  ;;  %v2578_v37 = vpack.c.bf16 %v972_v48, %v971_v25  ;;  %v977_v42 = vld [vmem:[%s4274_s5 + $0x170] sm:$0xff] }
 0x23a   :  { %v3514_v51 = vsub.f32 %v849_v20, %v872_v49  ;;  %889 = vadd.xlane.f32.xlu1 %v882_v50  ;;  %v2570_v20 = vpack.c.bf16 %v968_v17, %v967_v15  ;;  %v957_v49 = vld [vmem:[%s4274_s5 + $0xd0] sm:$0xff]  ;;  %v958_v50 = vld [vmem:[%s4274_s5 + $0xd8] sm:$0xff]  ;;  %v2556_v15 = vpack.c.bf16 %v962_v13, %v961_v12  ;;  %v2596_v13 = vpack.c.bf16 %v1014_v2, %v1013_v63 }
 0x23b   :  { %v867_v52 = vpop.xlane.xlu1 %866  ;;  %v994_v17 = vld [vmem:[%s4274_s5 + $0x1f8] sm:$0xff]  ;;  %v1049_v63 = vld [vmem:[%s4274_s5 + $0x3b0] sm:$0xff] }
 0x23c   :  { %v873_v53 = vmul.f32 0.0078125, %v867_v52  ;;  %v880_v54 = vmul.f32 %v3514_v51, %v3514_v51  ;;  %2571 = vmatpush3.bf16.msra.mxu0 %v2570_v20  ;;  %v989_v52 = vld [vmem:[%s4274_s5 + $0x1d0] sm:$0xff]  ;;  %v2588_v16 = vpack.c.bf16 %v994_v17, %v993_v14  ;;  %v2628_v14 = vpack.c.bf16 %v1046_v4, %v1045_v3  ;;  %v1050_v4 = vld [vmem:[%s4274_s5 + $0x3b8] sm:$0xff] }
 0x23d   :  { %2573 = vmatprep.subr.bf16.mxu0 %v2572_v36  ;;  %v945_v20 = vld [vmem:[%s4274_s5 + $0x70] sm:$0xff]  ;;  %v1012_v36 = vld [vmem:[%s4274_s5 + $0x288] sm:$0xff] }
 0x23e   :  { %v3518_v55 = vsub.f32 %v854_v28, %v873_v53  ;;  %885 = vadd.xlane.f32.xlu0 %v880_v54  ;;  %v937_v28 = vld [vmem:[%s4274_s5 + $0x30] sm:$0xff]  ;;  %v2548_v53 = vpack.c.bf16 %v958_v50, %v957_v49  ;;  %v990_v54 = vld [vmem:[%s4274_s5 + $0x1d8] sm:$0xff]  ;;  %v2558_v26 = vpack.c.bf16 %v946_v21, %v945_v20  ;;  %v1879_v50 = vld [vmem:[%s4275_s3] ss:$0 sm:$0xff] }
 0x23f   :  { %v2542_v32 = vpack.c.bf16 %v938_v31, %v937_v28  ;;  %v2580_v59 = vpack.c.bf16 %v990_v54, %v989_v52  ;;  %v2590_v28 = vpack.c.bf16 %v978_v27, %v977_v42  ;;  %v1011_v31 = vld [vmem:[%s4274_s5 + $0x280] sm:$0xff]  ;;  %v1029_v42 = vld [vmem:[%s4274_s5 + $0x310] sm:$0xff] }
 0x240   :  { %v881_v56 = vmul.f32 %v3518_v55, %v3518_v55  ;;  %2575 = vmatpush3.bf16.msra.mxu0 %v2574_v39  ;;  %v2592_v33 = vpack.c.bf16 %v1012_v36, %v1011_v31  ;;  %v1030_v36 = vld [vmem:[%s4274_s5 + $0x318] sm:$0xff] }
 0x241   :  { %2543 = vmatpush3.bf16.msra.mxu1 %v2542_v32  ;;  %2577 = vmatprep.subr.bf16.mxu0 %v2576_v46  ;;  %v1043_v32 = vld [vmem:[%s4274_s5 + $0x380] sm:$0xff] }
 0x242   :  { %887 = vadd.xlane.f32.xlu1 %v881_v56  ;;  %2545 = vmatprep.subr.bf16.mxu1 %v2544_v41  ;;  %v941_v56 = vld [vmem:[%s4274_s5 + $0x50] sm:$0xff]  ;;  %v2624_v39 = vpack.c.bf16 %v1044_v38, %v1043_v32  ;;  %v1015_v32 = vld [vmem:[%s4274_s5 + $0x2a0] sm:$0xff] }
 0x243   :  { %v2550_v60 = vpack.c.bf16 %v942_v57, %v941_v56 }
 0x244   :  { %2579 = vmatpush3.bf16.msra.mxu0 %v2578_v37 }
 0x245   :  { %2547 = vmatpush3.bf16.msra.mxu1 %v2546_v24  ;;  %2581 = vmatprep.subr.bf16.mxu0 %v2580_v59 }
 0x246   :  { %2549 = vmatprep.subr.bf16.mxu1 %v2548_v53  ;;  %v1880_v53 = vld [vmem:[%s4276_s4] ss:$0 sm:$0xff] }
 0x248   :  { %2583 = vmatpush3.bf16.msra.mxu0 %v2582_v30 }
 0x249   :  { %2551 = vmatpush3.bf16.msra.mxu1 %v2550_v60  ;;  %2585 = vmatprep.subr.bf16.mxu0 %v2584_v58 }
 0x24a   :  { %2553 = vmatprep.subr.bf16.mxu1 %v2552_v1 }
 0x24c   :  { %2587 = vmatpush3.bf16.msra.mxu0 %v2586_v11 }
 0x24d   :  { %2555 = vmatpush3.bf16.msra.mxu1 %v2554_v5  ;;  %2589 = vmatprep.subr.bf16.mxu0 %v2588_v16  ;;  %v997_v16 = vld [vmem:[%s4274_s5 + $0x210] sm:$0xff] }
 0x24e   :  { %2557 = vmatprep.subr.bf16.mxu1 %v2556_v15 }
 0x250   :  { %2591 = vmatpush3.bf16.msra.mxu0 %v2590_v28 }
 0x251   :  { %2559 = vmatpush3.bf16.msra.mxu1 %v2558_v26  ;;  %2625 = vmatprep.subr.bf16.mxu0 %v2624_v39  ;;  %v998_v26 = vld [vmem:[%s4274_s5 + $0x218] sm:$0xff] }
 0x252   :  { %2593 = vmatprep.subr.bf16.mxu1 %v2592_v33 }
 0x2c4   :  { %v884_v22 = vpop.xlane.xlu0 %883 }
 0x2c5   :  { %v891_v23 = vmul.f32 0.0078125, %v884_v22 }
 0x2c7   :  { %v895_v40 = vadd.f32 1e-06, %v891_v23  ;;  %v890_v41 = vpop.xlane.xlu1 %889  ;;  %v1016_v23 = vld [vmem:[%s4274_s5 + $0x2a8] sm:$0xff] }
 0x2c8   :  { %v894_v43 = vmul.f32 0.0078125, %v890_v41  ;;  %v1048_v41 = vld [vmem:[%s4274_s5 + $0x3a8] sm:$0xff] }
 0x2c9   :  { %2689 = vrsqrt.f32 %v895_v40  ;;  %v1047_v40 = vld [vmem:[%s4274_s5 + $0x3a0] sm:$0xff] }
 0x2ca   :  { %v898_v44 = vadd.f32 1e-06, %v894_v43 }
 0x2cb   :  { %v886_v45 = vpop.xlane.xlu0 %885 }
 0x2cc   :  { %2691 = vrsqrt.f32 %v898_v44  ;;  %v892_v46 = vmul.f32 0.0078125, %v886_v45  ;;  %v2598_v45 = vpack.c.bf16 %v998_v26, %v997_v16 }
 0x2ce   :  { %v896_v24 = vadd.f32 1e-06, %v892_v46 }
 0x2cf   :  { %v888_v25 = vpop.xlane.xlu1 %887 }
 0x2d0   :  { %2693 = vrsqrt.f32 %v896_v24  ;;  %v893_v48 = vmul.f32 0.0078125, %v888_v25 }
 0x2d2   :  { %v897_v37 = vadd.f32 1e-06, %v893_v48 }
 0x2d3   :  { %v2690_v49 = vpop.eup %2689 }
 0x2d4   :  { %v903_v52 = vmul.f32 %v2690_v49, %v3506_v47  ;;  %2695 = vrsqrt.f32 %v897_v37  ;;  %v2630_v49 = vpack.c.bf16 %v1030_v36, %v1029_v42  ;;  %v2636_v42 = vpack.c.bf16 %v1050_v4, %v1049_v63  ;;  %v1052_v36 = vld [vmem:[%s4274_s5 + $0x3c8] sm:$0xff]  ;;  %v1023_v63 = vld [vmem:[%s4274_s5 + $0x2e0] sm:$0xff] }
 0x2d6   :  { %v2692_v54 = vpop.eup %2691  ;;  %v913_v56 = vmul.f32 %v1879_v50, %v903_v52  ;;  %v2632_v52 = vpack.c.bf16 %v1048_v41, %v1047_v40  ;;  %v1003_v41 = vld [vmem:[%s4274_s5 + $0x240] sm:$0xff] }
 0x2d7   :  { %v906_v57 = vmul.f32 %v2692_v54, %v3510_v35  ;;  %v1028_v35 = vld [vmem:[%s4274_s5 + $0x308] sm:$0xff] }
 0x2d8   :  { %v923_v59 = vadd.f32 %v1880_v53, %v913_v56  ;;  %v2626_v10 = vpack.c.bf16 %v1028_v35, %v1027_v62  ;;  %v1017_v62 = vld [vmem:[%s4274_s5 + $0x2b0] sm:$0xff]  ;;  %v1018_v35 = vld [vmem:[%s4274_s5 + $0x2b8] sm:$0xff] }
 0x2d9   :  { %v916_v60 = vmul.f32 %v1879_v50, %v906_v57  ;;  %v2604_v26 = vpack.c.bf16 %v1018_v35, %v1017_v62  ;;  %v1037_v62 = vld [vmem:[%s4274_s5 + $0x350] sm:$0xff]  ;;  %v1038_v35 = vld [vmem:[%s4274_s5 + $0x358] sm:$0xff] }
 0x2da   :  { %v2694_v47 = vpop.eup %2693  ;;  %v3716_v30 = vmax.f32 %v923_v59, 0.0  ;;  %v2646_v4 = vpack.c.bf16 %v1038_v35, %v1037_v62 }
 0x2db   :  { %v926_v0 = vadd.f32 %v1880_v53, %v916_v60  ;;  %v904_v1 = vmul.f32 %v2694_v47, %v3514_v51  ;;  %v1000_v60 = vld [vmem:[%s4274_s5 + $0x228] sm:$0xff] }
 0x2dc   :  { %v1090_v51 = vrot.slane %v3716_v30, 5  ;;  %v1114_v12 = vrot.slane %v3716_v30, 7  ;;  %v1078_v27 = vrot.slane %v3716_v30, 4  ;;  %v1102_v28 = vrot.slane %v3716_v30, 6 }
 0x2dd   :  { %v3737_v58 = vmax.f32 %v926_v0, 0.0  ;;  %v914_v5 = vmul.f32 %v1879_v50, %v904_v1 }
 0x2de   :  { %v2696_v11 = vpop.eup %2695 }
 0x2df   :  { %v924_v15 = vadd.f32 %v1880_v53, %v914_v5  ;;  %v905_v17 = vmul.f32 %v2696_v11, %v3518_v55  ;;  %v1093_v20 = vrot.slane %v3737_v58, 5  ;;  %v1117_v21 = vrot.slane %v3737_v58, 7  ;;  %v1001_v5 = vld [vmem:[%s4274_s5 + $0x230] sm:$0xff]  ;;  %v1002_v11 = vld [vmem:[%s4274_s5 + $0x238] sm:$0xff] }
 0x2e0   :  { %v1081_v55 = vrot.slane %v3737_v58, 4  ;;  %v1105_v31 = vrot.slane %v3737_v58, 6 }
 0x2e1   :  { %v3763_v33 = vmax.f32 %v924_v15, 0.0  ;;  %v915_v38 = vmul.f32 %v1879_v50, %v905_v17  ;;  %v1097_v39 = vsel %vm301_vm0, %v1093_v20, %v1090_v51  ;;  %v1121_v22 = vsel %vm339_vm2, %v1117_v21, %v1114_v12  ;;  %v1019_v17 = vld [vmem:[%s4274_s5 + $0x2c0] sm:$0xff] }
 0x2e2   :  { %1882 = vmatprep.mubr.msk.f32.mxu1 %vm306_vm1, %v1097_v39  ;;  %1886 = vmatprep.mubr.msk.f32.mxu0 %vm344_vm4, %v1121_v22  ;;  %v3790_v43 = vsel %vm282_vm3, %v1081_v55, %v1078_v27  ;;  %v1109_v44 = vsel %vm320_vm6, %v1105_v31, %v1102_v28  ;;  %v2600_v50 = vpack.c.bf16 %v1016_v23, %v1015_v32 }
 0x2e3   :  { %v925_v46 = vadd.f32 %v1880_v53, %v915_v38  ;;  %1883 = vmatmul.mubr.msk.f32.vlgmr.msra.gmra.mrb[16].mxu1 %vm287_vm5, %v3790_v43  ;;  %1887 = vmatmul.mubr.msk.f32.vlgmr.msra.gmra.mrb[20].mxu0 %vm325_vm7, %v1109_v44  ;;  %v1091_v24 = vrot.slane %v3763_v33, 5  ;;  %v1115_v25 = vrot.slane %v3763_v33, 7  ;;  %v1079_v48 = vrot.slane %v3763_v33, 4  ;;  %v999_v53 = vld [vmem:[%s4274_s5 + $0x220] sm:$0xff]  ;;  %v1004_v44 = vld [vmem:[%s4274_s5 + $0x248] sm:$0xff] }
 0x2e4   :  { %2595 = vmatpush3.bf16.msra.mxu1 %v2594_v6  ;;  %2627 = vmatpush3.bf16.msra.mxu0 %v2626_v10  ;;  %v1103_v37 = vrot.slane %v3763_v33, 6  ;;  %v2602_v6 = vpack.c.bf16 %v1000_v60, %v999_v53  ;;  %v2634_v10 = vpack.c.bf16 %v1032_v29, %v1031_v61  ;;  %v2606_v32 = vpack.c.bf16 %v1002_v11, %v1001_v5  ;;  %v1005_v60 = vld [vmem:[%s4274_s5 + $0x250] sm:$0xff]  ;;  %v1006_v61 = vld [vmem:[%s4274_s5 + $0x258] sm:$0xff]  ;;  %v1007_v5 = vld [vmem:[%s4274_s5 + $0x260] sm:$0xff] }
 0x2e5   :  { %v3808_v54 = vmax.f32 %v925_v46, 0.0  ;;  %v1096_v56 = vsel %vm301_vm0, %v1090_v51, %v1091_v24  ;;  %v1120_v57 = vsel %vm339_vm2, %v1114_v12, %v1115_v25  ;;  %2597 = vmatprep.subr.bf16.mxu1 %v2596_v13  ;;  %2629 = vmatprep.subr.bf16.mxu0 %v2628_v14  ;;  %v3816_v59 = vsel %vm282_vm3, %v1078_v27, %v1079_v48  ;;  %v1033_v51 = vld [vmem:[%s4274_s5 + $0x330] sm:$0xff]  ;;  %v1034_v12 = vld [vmem:[%s4274_s5 + $0x338] sm:$0xff]  ;;  %v1020_v27 = vld [vmem:[%s4274_s5 + $0x2c8] sm:$0xff] }
 0x2e6   :  { %1245 = vmatprep.mubr.f32.mxu1 %v1096_v56  ;;  %1330 = vmatprep.mubr.f32.mxu0 %v1120_v57  ;;  %v1108_v47 = vsel %vm320_vm6, %v1102_v28, %v1103_v37  ;;  %v1051_v28 = vld [vmem:[%s4274_s5 + $0x3c0] sm:$0xff]  ;;  %v2638_v38 = vpack.c.bf16 %v1034_v12, %v1033_v51  ;;  %v1131_v23 = vrot.slane %v3763_v33, 1  ;;  %v1155_v40 = vrot.slane %v3763_v33, 3  ;;  %v1036_v46 = vld [vmem:[%s4274_s5 + $0x348] sm:$0xff] }
 0x2e7   :  { %1246 = vmatmul.mubr.f32.gmra.mrb[18].mxu1 %v3816_v59  ;;  %1331 = vmatmul.mubr.f32.gmra.mrb[22].mxu0 %v1108_v47  ;;  %v1092_v0 = vrot.slane %v3808_v54, 5  ;;  %v1116_v1 = vrot.slane %v3808_v54, 7  ;;  %v1080_v2 = vrot.slane %v3808_v54, 4  ;;  %v1104_v3 = vrot.slane %v3808_v54, 6  ;;  %v1039_v51 = vld [vmem:[%s4274_s5 + $0x360] sm:$0xff]  ;;  %v1040_v12 = vld [vmem:[%s4274_s5 + $0x368] sm:$0xff] }
 0x2e8   :  { %2599 = vmatpush3.bf16.msra.mxu1 %v2598_v45  ;;  %2631 = vmatpush3.bf16.msra.mxu0 %v2630_v49  ;;  %v2640_v45 = vpack.c.bf16 %v1052_v36, %v1051_v28  ;;  %v1154_v49 = vrot.slane %v3716_v30, 3 }
 0x2e9   :  { %v1095_v13 = vsel %vm301_vm0, %v1091_v24, %v1092_v0  ;;  %v1119_v14 = vsel %vm339_vm2, %v1115_v25, %v1116_v1  ;;  %2601 = vmatprep.subr.bf16.mxu1 %v2600_v50  ;;  %2633 = vmatprep.subr.bf16.mxu0 %v2632_v52  ;;  %v3864_v15 = vsel %vm282_vm3, %v1079_v48, %v1080_v2  ;;  %v1021_v24 = vld [vmem:[%s4274_s5 + $0x2d0] sm:$0xff]  ;;  %v1022_v50 = vld [vmem:[%s4274_s5 + $0x2d8] sm:$0xff] }
 0x2ea   :  { %1884 = vmatprep.mubr.msk.f32.mxu1 %vm306_vm1, %v1095_v13  ;;  %1888 = vmatprep.mubr.msk.f32.mxu0 %vm344_vm4, %v1119_v14  ;;  %v1107_v16 = vsel %vm320_vm6, %v1103_v37, %v1104_v3  ;;  %v1094_v39 = vsel %vm301_vm0, %v1092_v0, %v1093_v20  ;;  %v1118_v22 = vsel %vm339_vm2, %v1116_v1, %v1117_v21  ;;  %v1035_v21 = vld [vmem:[%s4274_s5 + $0x340] sm:$0xff]  ;;  %v1130_v37 = vrot.slane %v3716_v30, 1  ;;  %v1053_v52 = vld [vmem:[%s4274_s5 + $0x3d0] sm:$0xff]  ;;  %v1024_v0 = vld [vmem:[%s4274_s5 + $0x2e8] sm:$0xff] }
 0x2eb   :  { %1885 = vmatmul.mubr.msk.f32.gmra.mrb[20].mxu1 %vm287_vm5, %v3864_v15  ;;  %1889 = vmatmul.mubr.msk.f32.gmra.mrb[24].mxu0 %vm325_vm7, %v1107_v16  ;;  %v2608_v20 = vpack.c.bf16 %v1020_v27, %v1019_v17  ;;  %v3918_v25 = vsel %vm282_vm3, %v1080_v2, %v1081_v55  ;;  %v1106_v48 = vsel %vm320_vm6, %v1104_v3, %v1105_v31  ;;  %v1054_v55 = vld [vmem:[%s4274_s5 + $0x3d8] sm:$0xff]  ;;  %v1055_v1 = vld [vmem:[%s4274_s5 + $0x3e0] sm:$0xff]  ;;  %v1056_v2 = vld [vmem:[%s4274_s5 + $0x3e8] sm:$0xff]  ;;  %vm1712_vm0 = vcmask 1041409  }
 0x2ec   :  { %2603 = vmatpush3.bf16.msra.mxu1 %v2602_v6  ;;  %2635 = vmatpush3.bf16.msra.mxu0 %v2634_v10  ;;  %v2610_v31 = vpack.c.bf16 %v1004_v44, %v1003_v41  ;;  %v1136_v53 = vsel %vm368_vm8, %v1130_v37, %v1131_v23  ;;  %v1160_v56 = vsel %vm406_vm9, %v1154_v49, %v1155_v40  ;;  %v1008_v6 = vld [vmem:[%s4274_s5 + $0x268] sm:$0xff]  ;;  %v1025_v13 = vld [vmem:[%s4274_s5 + $0x2f0] sm:$0xff]  ;;  %v1026_v14 = vld [vmem:[%s4274_s5 + $0x2f8] sm:$0xff]  ;;  %vm1714_vm1 = vcmask 1042434  }
 0x2ed   :  { %1255 = vmatprep.mubr.f32.mxu1 %v1094_v39  ;;  %1340 = vmatprep.mubr.f32.mxu0 %v1118_v22  ;;  %v2642_v57 = vpack.c.bf16 %v1036_v46, %v1035_v21  ;;  %v2612_v29 = vpack.c.bf16 %v1022_v50, %v1021_v24  ;;  %v2644_v47 = vpack.c.bf16 %v1054_v55, %v1053_v52  ;;  %v1057_v17 = vld [vmem:[%s4274_s5 + $0x3f0] sm:$0xff]  ;;  %v1058_v16 = vld [vmem:[%s4274_s5 + $0x3f8] sm:$0xff]  ;;  %v1059_v22 = vld [vmem:[%s4274_s5 + $0x400] sm:$0xff]  ;;  %v1143_v21 = vrot.slane %v3763_v33, 2 }
 0x2ee   :  { %2605 = vmatprep.subr.bf16.mxu1 %v2604_v26  ;;  %2637 = vmatprep.subr.bf16.mxu0 %v2636_v42  ;;  %v2614_v3 = vpack.c.bf16 %v1006_v61, %v1005_v60  ;;  %v2616_v10 = vpack.c.bf16 %v1024_v0, %v1023_v63  ;;  %v2648_v11 = vpack.c.bf16 %v1056_v2, %v1055_v1  ;;  %v1009_v27 = vld [vmem:[%s4274_s5 + $0x270] sm:$0xff]  ;;  %v1042_v39 = vld [vmem:[%s4274_s5 + $0x378] sm:$0xff]  ;;  %v1060_v41 = vld [vmem:[%s4274_s5 + $0x408] sm:$0xff]  ;;  %v1132_v46 = vrot.slane %v3808_v54, 1 }
 0x2ef   :  { %1256 = vmatmul.mubr.f32.gmra.mrb[22].mxu1 %v3918_v25  ;;  %1341 = vmatmul.mubr.f32.gmra.mrb[26].mxu0 %v1106_v48  ;;  %v2618_v26 = vpack.c.bf16 %v1008_v6, %v1007_v5  ;;  %v2650_v42 = vpack.c.bf16 %v1040_v12, %v1039_v51  ;;  %v2620_v28 = vpack.c.bf16 %v1026_v14, %v1025_v13  ;;  %v1156_v24 = vrot.slane %v3808_v54, 3  ;;  %v1061_v48 = vld [vmem:[%s4274_s5 + $0x410] sm:$0xff]  ;;  %v1062_v50 = vld [vmem:[%s4274_s5 + $0x418] sm:$0xff]  ;;  %v1063_v60 = vld [vmem:[%s4274_s5 + $0x420] sm:$0xff] }
 0x2f0   :  { %2607 = vmatpush3.bf16.msra.mxu1 %v2606_v32  ;;  %2639 = vmatpush3.bf16.msra.mxu0 %v2638_v38  ;;  %v2652_v36 = vpack.c.bf16 %v1058_v16, %v1057_v17  ;;  %v1010_v32 = vld [vmem:[%s4274_s5 + $0x278] sm:$0xff]  ;;  %v1041_v38 = vld [vmem:[%s4274_s5 + $0x370] sm:$0xff]  ;;  %v1142_v52 = vrot.slane %v3716_v30, 2  ;;  %v1064_v61 = vld [vmem:[%s4274_s5 + $0x428] sm:$0xff]  ;;  %vm1716_vm2 = vcmask 1043459   ;;  %vm1825_vm3 = vcmask 31744  }
 0x2f1   :  { %1410 = vmatprep.mubr.f32.mxu1 %v1136_v53  ;;  %1495 = vmatprep.mubr.f32.mxu0 %v1160_v56  ;;  %v2622_v44 = vpack.c.bf16 %v1010_v32, %v1009_v27  ;;  %v2660_v53 = vpack.c.bf16 %v1062_v50, %v1061_v48  ;;  %v1135_v56 = vsel %vm368_vm8, %v1131_v23, %v1132_v46  ;;  %v1133_v23 = vrot.slane %v3737_v58, 1  ;;  %v1065_v63 = vld [vmem:[%s4274_s5 + $0x430] sm:$0xff]  ;;  %v1066_v0 = vld [vmem:[%s4274_s5 + $0x438] sm:$0xff]  ;;  %v1067_v5 = vld [vmem:[%s4274_s5 + $0x440] sm:$0xff] }
 0x2f2   :  { %2609 = vmatprep.subr.bf16.mxu1 %v2608_v20  ;;  %2641 = vmatprep.subr.bf16.mxu0 %v2640_v45  ;;  %v2654_v20 = vpack.c.bf16 %v1042_v39, %v1041_v38  ;;  %v2656_v45 = vpack.c.bf16 %v1060_v41, %v1059_v22  ;;  %v1148_v55 = vsel %vm387_vm10, %v1142_v52, %v1143_v21  ;;  %v1068_v6 = vld [vmem:[%s4274_s5 + $0x448] sm:$0xff]  ;;  %v1073_v51 = vld [vmem:[%s4274_s5 + $0x470] sm:$0xff]  ;;  %v1881_v17 = vld [vmem:[%s4277_s6] ss:$0 sm:$0xff] }
 0x2f3   :  { %v1134_v62 = vsel %vm368_vm8, %v1132_v46, %v1133_v23  ;;  %v2668_v2 = vpack.c.bf16 %v1066_v0, %v1065_v63 }
 0x2f4   :  { %2611 = vmatpush3.bf16.msra.mxu1 %v2610_v31  ;;  %2643 = vmatpush3.bf16.msra.mxu0 %v2642_v57  ;;  %v1144_v31 = vrot.slane %v3808_v54, 2  ;;  %v1159_v57 = vsel %vm406_vm9, %v1155_v40, %v1156_v24 }
 0x2f5   :  { %2613 = vmatprep.subr.bf16.mxu1 %v2612_v29  ;;  %2645 = vmatprep.subr.bf16.mxu0 %v2644_v47  ;;  %v1157_v29 = vrot.slane %v3737_v58, 3  ;;  %v2664_v47 = vpack.c.bf16 %v1064_v61, %v1063_v60 }
 0x2f6   :  { %v1147_v40 = vsel %vm387_vm10, %v1143_v21, %v1144_v31 }
 0x2f7   :  { %v1158_v35 = vsel %vm406_vm9, %v1156_v24, %v1157_v29 }
 0x2f8   :  { %2615 = vmatpush3.bf16.msra.mxu1 %v2614_v3  ;;  %2647 = vmatpush3.bf16.msra.mxu0 %v2646_v4  ;;  %v1137_v3 = vsel %vm368_vm8, %v1133_v23, %v1130_v37  ;;  %v1161_v4 = vsel %vm406_vm9, %v1157_v29, %v1154_v49  ;;  %v1069_v37 = vld [vmem:[%s4274_s5 + $0x450] sm:$0xff]  ;;  %v1070_v49 = vld [vmem:[%s4274_s5 + $0x458] sm:$0xff] }
 0x2f9   :  { %2617 = vmatprep.subr.bf16.mxu1 %v2616_v10  ;;  %2649 = vmatprep.subr.bf16.mxu0 %v2648_v11  ;;  %v2676_v7 = vpack.c.bf16 %v1070_v49, %v1069_v37  ;;  %v1072_v10 = vld [vmem:[%s4274_s5 + $0x468] sm:$0xff] }
 0x2fc   :  { %2619 = vmatpush3.bf16.msra.mxu1 %v2618_v26  ;;  %2651 = vmatpush3.bf16.msra.mxu0 %v2650_v42 }
 0x2fd   :  { %2621 = vmatprep.subr.bf16.mxu1 %v2620_v28  ;;  %2653 = vmatprep.subr.bf16.mxu0 %v2652_v36 }
 0x300   :  { %2623 = vmatpush3.bf16.msra.mxu1 %v2622_v44  ;;  %2655 = vmatpush3.bf16.msra.mxu0 %v2654_v20 }
 0x301   :  { %2657 = vmatprep.subr.bf16.mxu1 %v2656_v45 }
 0x303   :  { %1411 = vmatmul.mubr.f32.vlgmr.msra.gmra.mrb[24].mxu1 %v3716_v30  ;;  %1496 = vmatmul.mubr.f32.vlgmr.msra.gmra.mrb[28].mxu0 %v1148_v55 }
 0x304   :  { %1890 = vmatprep.mubr.msk.f32.mxu1 %vm376_vm11, %v1135_v56  ;;  %1892 = vmatprep.mubr.msk.f32.mxu0 %vm414_vm12, %v1159_v57 }
 0x305   :  { %2659 = vmatpush3.bf16.msra.mxu1 %v2656_v45 }
 0x306   :  { %2661 = vmatprep.subr.bf16.mxu1 %v2660_v53 }
 0x307   :  { %1416 = vmatmul.mubr.f32.gmra.mrb[26].mxu1 %v3763_v33  ;;  %1893 = vmatmul.mubr.msk.f32.gmra.mrb[30].mxu0 %vm395_vm13, %v1147_v40  ;;  %v1145_v33 = vrot.slane %v3737_v58, 2 }
 0x308   :  { %1420 = vmatprep.mubr.f32.mxu1 %v1134_v62  ;;  %1505 = vmatprep.mubr.f32.mxu0 %v1158_v35 }
 0x309   :  { %2663 = vmatpush3.bf16.msra.mxu1 %v2660_v53  ;;  %v1146_v1 = vsel %vm387_vm10, %v1144_v31, %v1145_v33  ;;  %v1149_v30 = vsel %vm387_vm10, %v1145_v33, %v1142_v52 }
 0x30a   :  { %2665 = vmatprep.subr.bf16.mxu1 %v2664_v47 }
 0x30b   :  { %1421 = vmatmul.mubr.f32.gmra.mrb[28].mxu1 %v3808_v54  ;;  %1506 = vmatmul.mubr.f32.gmra.mrb[32].mxu0 %v1146_v1  ;;  %v2672_v54 = vpack.c.bf16 %v1068_v6, %v1067_v5 }
 0x30c   :  { %1891 = vmatprep.mubr.msk.f32.mxu1 %vm376_vm11, %v1137_v3  ;;  %1894 = vmatprep.mubr.msk.f32.mxu0 %vm414_vm12, %v1161_v4 }
 0x30d   :  { %2667 = vmatpush3.bf16.msra.mxu1 %v2664_v47 }
 0x30e   :  { %2669 = vmatprep.subr.bf16.mxu1 %v2668_v2 }
 0x30f   :  { %1426 = vmatmul.mubr.f32.gmra.mrb[30].mxu1 %v3737_v58  ;;  %1895 = vmatmul.mubr.msk.f32.gmra.mrb[34].mxu0 %vm395_vm13, %v1149_v30  ;;  %v1071_v58 = vld [vmem:[%s4274_s5 + $0x460] sm:$0xff] }
 0x310   :  { %2362 = vmatprep.mubr.f32.mxu1 %v3816_v59  ;;  %v2680_v11 = vpack.c.bf16 %v1072_v10, %v1071_v58  ;;  %v1074_v59 = vld [vmem:[%s4274_s5 + $0x478] sm:$0xff] }
 0x311   :  { %2671 = vmatpush3.bf16.msra.mxu1 %v2668_v2  ;;  %v2684_v12 = vpack.c.bf16 %v1074_v59, %v1073_v51 }
 0x312   :  { %2673 = vmatprep.subr.bf16.mxu1 %v2672_v54 }
 0x315   :  { %2675 = vmatpush3.bf16.msra.mxu1 %v2672_v54 }
 0x316   :  { %2677 = vmatprep.subr.bf16.mxu1 %v2676_v7 }
 0x319   :  { %2679 = vmatpush3.bf16.msra.mxu1 %v2676_v7 }
 0x31a   :  { %2681 = vmatprep.subr.bf16.mxu1 %v2680_v11 }
 0x31d   :  { %2683 = vmatpush3.bf16.msra.mxu1 %v2680_v11 }
 0x31e   :  { %2685 = vmatprep.subr.bf16.mxu1 %v2684_v12 }
 0x321   :  { %2687 = vmatpush3.bf16.msra.mxu1 %v2684_v12 }
 0x324   :  { %2363 = vmatmul.mubr.msk.f32.vlgmr.msra.gmra.mrb[32].mxu1 %vm424_vm14, %v3864_v15 }
 0x325   :  { %2365 = vmatprep.mubr.f32.mxu1 %v3918_v25 }
 0x328   :  { %2366 = vmatmul.mubr.msk.f32.gmra.mrb[34].mxu1 %vm424_vm14, %v3790_v43 }
 0x3b6   :  { %v2128_v13 = vpop.f32.mrb[16].mxu1  ;;  %v2172_v14 = vpop.f32.mrb[20].mxu0 }
 0x3b7   :  { %v2129_v16 = vpop.f32.mrb[17].mxu1  ;;  %v2173_v26 = vpop.f32.mrb[21].mxu0 }
 0x3b8   :  { %v2130_v42 = vadd.f32 %v2129_v16, %v2128_v13  ;;  %v2174_v27 = vadd.f32 %v2173_v26, %v2172_v14 }
 0x3ba   :  { %v1243_v28 = vadd.f32 %v2130_v42, %v1881_v17  ;;  %v2131_v36 = vpop.f32.mrb[18].mxu1  ;;  %v2175_v32 = vpop.f32.mrb[22].mxu0 }
 0x3bb   :  { %v2132_v15 = vpop.f32.mrb[19].mxu1  ;;  %v2176_v38 = vpop.f32.mrb[23].mxu0 }
 0x3bc   :  { %v1328_v25 = vadd.f32 %v2174_v27, %v1243_v28  ;;  %v2133_v39 = vadd.f32 %v2132_v15, %v2131_v36  ;;  %v2177_v22 = vadd.f32 %v2176_v38, %v2175_v32 }
 0x3be   :  { %v1248_v34 = vadd.f32 %v2133_v39, %v1881_v17  ;;  %v2134_v43 = vpop.f32.mrb[20].mxu1  ;;  %v2178_v41 = vpop.f32.mrb[24].mxu0 }
 0x3bf   :  { %v2135_v44 = vpop.f32.mrb[21].mxu1  ;;  %v2179_v20 = vpop.f32.mrb[25].mxu0 }
 0x3c0   :  { %v1333_v45 = vadd.f32 %v2177_v22, %v1248_v34  ;;  %v2136_v21 = vadd.f32 %v2135_v44, %v2134_v43  ;;  %v2180_v46 = vadd.f32 %v2179_v20, %v2178_v41 }
 0x3c2   :  { %v1253_v24 = vadd.f32 %v2136_v21, %v1881_v17  ;;  %v2137_v48 = vpop.f32.mrb[22].mxu1  ;;  %v2181_v50 = vpop.f32.mrb[26].mxu0 }
 0x3c3   :  { %v2138_v52 = vpop.f32.mrb[23].mxu1  ;;  %v2182_v55 = vpop.f32.mrb[27].mxu0 }
 0x3c4   :  { %v1338_v31 = vadd.f32 %v2180_v46, %v1253_v24  ;;  %v2139_v53 = vadd.f32 %v2138_v52, %v2137_v48  ;;  %v2183_v56 = vadd.f32 %v2182_v55, %v2181_v50 }
 0x3c6   :  { %v1258_v57 = vadd.f32 %v2139_v53, %v1881_v17 }
 0x3c8   :  { %v1343_v60 = vadd.f32 %v2183_v56, %v1258_v57 }
 0x3d6   :  { %v2216_v61 = vpop.f32.mrb[24].mxu1  ;;  %v2260_v23 = vpop.f32.mrb[28].mxu0 }
 0x3d7   :  { %v2217_v29 = vpop.f32.mrb[25].mxu1  ;;  %v2261_v40 = vpop.f32.mrb[29].mxu0 }
 0x3d8   :  { %v2218_v47 = vadd.f32 %v2217_v29, %v2216_v61  ;;  %v2262_v62 = vadd.f32 %v2261_v40, %v2260_v23 }
 0x3da   :  { %v1413_v35 = vadd.f32 %v2218_v47, %v1328_v25  ;;  %v2219_v63 = vpop.f32.mrb[26].mxu1  ;;  %v2263_v0 = vpop.f32.mrb[30].mxu0 }
 0x3db   :  { %v2220_v33 = vpop.f32.mrb[27].mxu1  ;;  %v2264_v1 = vpop.f32.mrb[31].mxu0 }
 0x3dc   :  { %v2221_v2 = vadd.f32 %v2220_v33, %v2219_v63  ;;  %v2265_v3 = vadd.f32 %v2264_v1, %v2263_v0  ;;  %v1498_v4 = vadd.f32 %v2262_v62, %v1413_v35  ;;  %v1898_v33 = vld [vmem:[%s4278_s7] ss:$0 sm:$0xff] }
 0x3de   :  { %v1418_v5 = vadd.f32 %v2221_v2, %v1333_v45  ;;  %v2222_v6 = vpop.f32.mrb[28].mxu1  ;;  %v2266_v30 = vpop.f32.mrb[32].mxu0  ;;  %v1899_v2 = vld [vmem:[%s4279_s8] ss:$0 sm:$0xff] }
 0x3df   :  { %v2223_v54 = vpop.f32.mrb[29].mxu1  ;;  %v2267_v37 = vpop.f32.mrb[33].mxu0 }
 0x3e0   :  { %v2224_v49 = vadd.f32 %v2223_v54, %v2222_v6  ;;  %v2268_v7 = vadd.f32 %v2267_v37, %v2266_v30  ;;  %v1503_v58 = vadd.f32 %v2265_v3, %v1418_v5 }
 0x3e2   :  { %v1423_v10 = vadd.f32 %v2224_v49, %v1338_v31  ;;  %v2225_v11 = vpop.f32.mrb[30].mxu1  ;;  %v2269_v51 = vpop.f32.mrb[34].mxu0 }
 0x3e3   :  { %v2226_v59 = vpop.f32.mrb[31].mxu1  ;;  %v2270_v12 = vpop.f32.mrb[35].mxu0 }
 0x3e4   :  { %v2227_v13 = vadd.f32 %v2226_v59, %v2225_v11  ;;  %v2271_v14 = vadd.f32 %v2270_v12, %v2269_v51  ;;  %v1508_v17 = vadd.f32 %v2268_v7, %v1423_v10 }
 0x3e6   :  { %v1428_v16 = vadd.f32 %v2227_v13, %v1343_v60 }
 0x3e8   :  { %v1513_v26 = vadd.f32 %v2271_v14, %v1428_v16 }
 0x3f7   :  { %v2364_v42 = vpop.f32.mrb[32].mxu1 }
 0x3f8   :  { %v1588_v27 = vadd.f32 %v2364_v42, %v1503_v58  ;;  %v1582_v28 = vpop.f32.mrb[33].mxu1 }
 0x3f9   :  { %v1583_v36 = vadd.f32 %v1582_v28, %v1498_v4 }
 0x3fb   :  { %v2367_v32 = vpop.f32.mrb[34].mxu1  ;;  %1601 = vadd.xlane.f32.xlu0 %v1583_v36 }
 0x3fc   :  { %v1598_v15 = vadd.f32 %v2367_v32, %v1513_v26  ;;  %v1592_v38 = vpop.f32.mrb[35].mxu1 }
 0x3fd   :  { %v1593_v25 = vadd.f32 %v1592_v38, %v1508_v17 }
 0x3ff   :  { %1605 = vadd.xlane.f32.xlu1 %v1593_v25  ;;  %1603 = vadd.xlane.f32.xlu0 %v1588_v27 }
 0x403   :  { %1607 = vadd.xlane.f32.xlu1 %v1598_v15 }
 0x488   :  { %v1602_v39 = vpop.xlane.xlu0 %1601 }
 0x489   :  { %v1609_v22 = vmul.f32 0.0078125, %v1602_v39 }
 0x48b   :  { %v1613_v34 = vsub.f32 %v1583_v36, %v1609_v22 }
 0x48c   :  { %v1606_v43 = vpop.xlane.xlu1 %1605  ;;  %v1604_v41 = vpop.xlane.xlu0 %1603 }
 0x48d   :  { %v1611_v44 = vmul.f32 0.0078125, %v1606_v43  ;;  %v1610_v20 = vmul.f32 0.0078125, %v1604_v41  ;;  %v1617_v45 = vmul.f32 %v1613_v34, %v1613_v34 }
 0x48f   :  { %v1615_v21 = vsub.f32 %v1593_v25, %v1611_v44  ;;  %v1614_v46 = vsub.f32 %v1588_v27, %v1610_v20  ;;  %1621 = vadd.xlane.f32.xlu0 %v1617_v45 }
 0x490   :  { %v1608_v24 = vpop.xlane.xlu1 %1607 }
 0x491   :  { %v1612_v48 = vmul.f32 0.0078125, %v1608_v24  ;;  %v1618_v50 = vmul.f32 %v1614_v46, %v1614_v46  ;;  %v1619_v52 = vmul.f32 %v1615_v21, %v1615_v21 }
 0x493   :  { %v1616_v55 = vsub.f32 %v1598_v15, %v1612_v48  ;;  %1623 = vadd.xlane.f32.xlu0 %v1618_v50  ;;  %1625 = vadd.xlane.f32.xlu1 %v1619_v52 }
 0x495   :  { %v1620_v31 = vmul.f32 %v1616_v55, %v1616_v55 }
 0x497   :  { %1627 = vadd.xlane.f32.xlu1 %v1620_v31 }
 0x51c   :  { %v1622_v53 = vpop.xlane.xlu0 %1621 }
 0x51d   :  { %v1629_v56 = vmul.f32 0.0078125, %v1622_v53 }
 0x51f   :  { %v1633_v57 = vadd.f32 1e-06, %v1629_v56 }
 0x520   :  { %v1624_v60 = vpop.xlane.xlu0 %1623  ;;  %v1626_v61 = vpop.xlane.xlu1 %1625 }
 0x521   :  { %2697 = vrsqrt.f32 %v1633_v57  ;;  %v1630_v23 = vmul.f32 0.0078125, %v1624_v60  ;;  %v1631_v29 = vmul.f32 0.0078125, %v1626_v61 }
 0x523   :  { %v1634_v40 = vadd.f32 1e-06, %v1630_v23  ;;  %v1635_v47 = vadd.f32 1e-06, %v1631_v29 }
 0x524   :  { %v1628_v62 = vpop.xlane.xlu1 %1627 }
 0x525   :  { %2699 = vrsqrt.f32 %v1634_v40  ;;  %v1632_v35 = vmul.f32 0.0078125, %v1628_v62 }
 0x526   :  { %2701 = vrsqrt.f32 %v1635_v47 }
 0x527   :  { %v1636_v63 = vadd.f32 1e-06, %v1632_v35 }
 0x529   :  { %2703 = vrsqrt.f32 %v1636_v63 }
 0x52b   :  { %v2698_v0 = vpop.eup %2697 }
 0x52c   :  { %v1641_v1 = vmul.f32 %v2698_v0, %v1613_v34 }
 0x52e   :  { %v1651_v3 = vmul.f32 %v1898_v33, %v1641_v1 }
 0x52f   :  { %v2700_v4 = vpop.eup %2699 }
 0x530   :  { %v2702_v5 = vpop.eup %2701  ;;  %v1661_v6 = vadd.f32 %v1899_v2, %v1651_v3  ;;  %v1642_v30 = vmul.f32 %v2700_v4, %v1614_v46 }
 0x531   :  { %v1643_v54 = vmul.f32 %v2702_v5, %v1615_v21 }
 0x532   :  { %v1665_v37 = vmax.f32 %v1661_v6, 0.0  ;;  %v1652_v49 = vmul.f32 %v1898_v33, %v1642_v30 }
 0x533   :  { %v2704_v7 = vpop.eup %2703  ;;  %v1653_v58 = vmul.f32 %v1898_v33, %v1643_v54 }
 0x534   :  { %v1662_v10 = vadd.f32 %v1899_v2, %v1652_v49  ;;  %v1644_v11 = vmul.f32 %v2704_v7, %v1616_v55  ;;  %v1669_v51 = vadd.f32 %v1665_v37, %v3059_v9 }
 0x535   :  { %v1663_v59 = vadd.f32 %v1899_v2, %v1653_v58 }
 0x536   :  { %v1666_v12 = vmax.f32 %v1662_v10, 0.0  ;;  %v1654_v13 = vmul.f32 %v1898_v33, %v1644_v11  ;;  %v1675_v14 = vcombine.high %v1669_v51, %v1669_v51  ;;  %v1680_v17 = vsel %vm1679_vm15, %v1669_v51, -inf }
 0x537   :  { %v1667_v16 = vmax.f32 %v1663_v59, 0.0  ;;  %v1681_v26 = vrot.slane %v1680_v17, 4 }
 0x538   :  { %v1664_v42 = vadd.f32 %v1899_v2, %v1654_v13  ;;  %v1670_v27 = vadd.f32 %v1666_v12, %v3083_v19  ;;  %v1687_v28 = vsel %vm1679_vm15, %v1675_v14, -inf }
 0x539   :  { %v1682_v36 = vmax.f32 %v1680_v17, %v1681_v26  ;;  %v1688_v32 = vrot.slane %v1687_v28, 4  ;;  %v1671_v15 = vadd.f32 %v1667_v16, %v3057_v8 }
 0x53a   :  { %v1668_v38 = vmax.f32 %v1664_v42, 0.0  ;;  %v1676_v25 = vcombine.high %v1670_v27, %v1670_v27  ;;  %v1694_v9 = vsel %vm1679_vm15, %v1670_v27, -inf }
 0x53b   :  { %v1683_v39 = vrot.slane %v1682_v36, 2  ;;  %v1689_v22 = vmax.f32 %v1687_v28, %v1688_v32  ;;  %v1695_v34 = vrot.slane %v1694_v9, 4  ;;  %v1753_v43 = vcombine.high %v1671_v15, %v1671_v15 }
 0x53c   :  { %v1701_v41 = vsel %vm1679_vm15, %v1676_v25, -inf  ;;  %v1672_v44 = vadd.f32 %v1668_v38, %v3081_v18  ;;  %v1757_v19 = vsel %vm1679_vm15, %v1671_v15, -inf }
 0x53d   :  { %v1684_v20 = vmax.f32 %v1682_v36, %v1683_v39  ;;  %v1690_v45 = vrot.slane %v1689_v22, 2  ;;  %v1696_v21 = vmax.f32 %v1694_v9, %v1695_v34  ;;  %v1702_v46 = vrot.slane %v1701_v41, 4 }
 0x53e   :  { %v1754_v8 = vcombine.high %v1672_v44, %v1672_v44  ;;  %v1758_v24 = vrot.slane %v1757_v19, 4  ;;  %v1764_v48 = vsel %vm1679_vm15, %v1753_v43, -inf  ;;  %v1771_v50 = vsel %vm1679_vm15, %v1672_v44, -inf }
 0x53f   :  { %v1685_v52 = vrot.slane %v1684_v20, 1  ;;  %v1691_v55 = vmax.f32 %v1689_v22, %v1690_v45  ;;  %v1697_v31 = vrot.slane %v1696_v21, 2  ;;  %v1703_v53 = vmax.f32 %v1701_v41, %v1702_v46 }
 0x540   :  { %v1759_v56 = vmax.f32 %v1757_v19, %v1758_v24  ;;  %v1765_v57 = vrot.slane %v1764_v48, 4  ;;  %v1772_v60 = vrot.slane %v1771_v50, 4  ;;  %v1778_v18 = vsel %vm1679_vm15, %v1754_v8, -inf }
 0x541   :  { %v1692_v61 = vrot.slane %v1691_v55, 1  ;;  %v1698_v23 = vmax.f32 %v1696_v21, %v1697_v31  ;;  %v1704_v29 = vrot.slane %v1703_v53, 2  ;;  %v1779_v35 = vrot.slane %v1778_v18, 4 }
 0x542   :  { %v1760_v40 = vrot.slane %v1759_v56, 2  ;;  %v1766_v47 = vmax.f32 %v1764_v48, %v1765_v57  ;;  %v1773_v62 = vmax.f32 %v1771_v50, %v1772_v60  ;;  %v1686_v63 = vmax.f32 %v1684_v20, %v1685_v52 }
 0x543   :  { %v1693_v0 = vmax.f32 %v1691_v55, %v1692_v61  ;;  %v1699_v33 = vrot.slane %v1698_v23, 1  ;;  %v1705_v1 = vmax.f32 %v1703_v53, %v1704_v29  ;;  %v1780_v5 = vmax.f32 %v1778_v18, %v1779_v35 }
 0x544   :  { %v1761_v2 = vmax.f32 %v1759_v56, %v1760_v40  ;;  %v1767_v3 = vrot.slane %v1766_v47, 2  ;;  %v1774_v4 = vrot.slane %v1773_v62, 2 }
 0x545   :  { %v1700_v6 = vmax.f32 %v1698_v23, %v1699_v33  ;;  %v1706_v30 = vrot.slane %v1705_v1, 1  ;;  %v1713_v54 = vsel %vm1712_vm0, %v1693_v0, %v1686_v63  ;;  %v1781_v58 = vrot.slane %v1780_v5, 2 }
 0x546   :  { %v1762_v37 = vrot.slane %v1761_v2, 1  ;;  %v1768_v49 = vmax.f32 %v1766_v47, %v1767_v3  ;;  %v1775_v7 = vmax.f32 %v1773_v62, %v1774_v4 }
 0x547   :  { %v1707_v10 = vmax.f32 %v1705_v1, %v1706_v30  ;;  %v1715_v11 = vsel %vm1714_vm1, %v1700_v6, %v1713_v54  ;;  %v1782_v12 = vmax.f32 %v1780_v5, %v1781_v58 }
 0x548   :  { %v1769_v51 = vrot.slane %v1768_v49, 1  ;;  %v1776_v59 = vrot.slane %v1775_v7, 1  ;;  %v1763_v14 = vmax.f32 %v1761_v2, %v1762_v37 }
 0x549   :  { %v1717_v13 = vsel %vm1716_vm2, %v1707_v10, %v1715_v11  ;;  %v1783_v26 = vrot.slane %v1782_v12, 1 }
 0x54a   :  { %1719 = vxpose.xlu0.b32.start.end [1/1] (short) %v1717_v13, 128  ;;  %v1770_v17 = vmax.f32 %v1768_v49, %v1769_v51  ;;  %v1777_v16 = vmax.f32 %v1775_v7, %v1776_v59 }
 0x54b   :  { %v1784_v42 = vmax.f32 %v1782_v12, %v1783_v26 }
 0x54c   :  { %v1789_v27 = vsel %vm1712_vm0, %v1770_v17, %v1763_v14 }
 0x54d   :  { %v1790_v28 = vsel %vm1714_vm1, %v1777_v16, %v1789_v27 }
 0x54e   :  { %v1791_v36 = vsel %vm1716_vm2, %v1784_v42, %v1790_v28 }
 0x54f   :  { %1793 = vxpose.xlu1.b32.start.end [1/1] (short) %v1791_v36, 128 }
 0x5ca   :  { %v1735_v32 = vpop.trf.xlu0 }
 0x5cb   :  { %1826 = vst.msk [vmem:[%s4280_s9] sm:$0xff] %vm1825_vm3, %v1735_v32 }
 0x5ce   :  { %v1736_v15 = vpop.trf.xlu0 }
 0x5cf   :  { %v1809_v38 = vpop.trf.xlu1  ;;  %1827 = vst.msk [vmem:[%s4280_s9 + $0x8] sm:$0xff] %vm1825_vm3, %v1736_v15 }
 0x5d0   :  { %1842 = vst.msk [vmem:[%s4280_s9 + $0x80] sm:$0xff] %vm1825_vm3, %v1809_v38 }
 0x5d2   :  { %v1737_v25 = vpop.trf.xlu0 }
 0x5d3   :  { %v1810_v9 = vpop.trf.xlu1  ;;  %1828 = vst.msk [vmem:[%s4280_s9 + $0x10] sm:$0xff] %vm1825_vm3, %v1737_v25 }
 0x5d4   :  { %1843 = vst.msk [vmem:[%s4280_s9 + $0x88] sm:$0xff] %vm1825_vm3, %v1810_v9 }
 0x5d6   :  { %v1738_v39 = vpop.trf.xlu0 }
 0x5d7   :  { %v1811_v22 = vpop.trf.xlu1  ;;  %1829 = vst.msk [vmem:[%s4280_s9 + $0x18] sm:$0xff] %vm1825_vm3, %v1738_v39 }
 0x5d8   :  { %1844 = vst.msk [vmem:[%s4280_s9 + $0x90] sm:$0xff] %vm1825_vm3, %v1811_v22 }
 0x5da   :  { %v1739_v34 = vpop.trf.xlu0 }
 0x5db   :  { %v1812_v43 = vpop.trf.xlu1  ;;  %1830 = vst.msk [vmem:[%s4280_s9 + $0x20] sm:$0xff] %vm1825_vm3, %v1739_v34 }
 0x5dc   :  { %1845 = vst.msk [vmem:[%s4280_s9 + $0x98] sm:$0xff] %vm1825_vm3, %v1812_v43 }
 0x5de   :  { %v1740_v41 = vpop.trf.xlu0 }
 0x5df   :  { %v1813_v44 = vpop.trf.xlu1  ;;  %1831 = vst.msk [vmem:[%s4280_s9 + $0x28] sm:$0xff] %vm1825_vm3, %v1740_v41 }
 0x5e0   :  { %1846 = vst.msk [vmem:[%s4280_s9 + $0xa0] sm:$0xff] %vm1825_vm3, %v1813_v44 }
 0x5e2   :  { %v1741_v19 = vpop.trf.xlu0 }
 0x5e3   :  { %v1814_v20 = vpop.trf.xlu1  ;;  %1832 = vst.msk [vmem:[%s4280_s9 + $0x30] sm:$0xff] %vm1825_vm3, %v1741_v19 }
 0x5e4   :  { %1847 = vst.msk [vmem:[%s4280_s9 + $0xa8] sm:$0xff] %vm1825_vm3, %v1814_v20 }
 0x5e6   :  { %v1742_v45 = vpop.trf.xlu0 }
 0x5e7   :  { %v1815_v21 = vpop.trf.xlu1  ;;  %1833 = vst.msk [vmem:[%s4280_s9 + $0x38] sm:$0xff] %vm1825_vm3, %v1742_v45 }
 0x5e8   :  { %1848 = vst.msk [vmem:[%s4280_s9 + $0xb0] sm:$0xff] %vm1825_vm3, %v1815_v21 }
 0x5ea   :  { %v1743_v46 = vpop.trf.xlu0 }
 0x5eb   :  { %v1816_v8 = vpop.trf.xlu1  ;;  %1834 = vst.msk [vmem:[%s4280_s9 + $0x40] sm:$0xff] %vm1825_vm3, %v1743_v46 }
 0x5ec   :  { %1849 = vst.msk [vmem:[%s4280_s9 + $0xb8] sm:$0xff] %vm1825_vm3, %v1816_v8 }
 0x5ee   :  { %v1744_v24 = vpop.trf.xlu0 }
 0x5ef   :  { %v1817_v48 = vpop.trf.xlu1  ;;  %1835 = vst.msk [vmem:[%s4280_s9 + $0x48] sm:$0xff] %vm1825_vm3, %v1744_v24 }
 0x5f0   :  { %1850 = vst.msk [vmem:[%s4280_s9 + $0xc0] sm:$0xff] %vm1825_vm3, %v1817_v48 }
 0x5f2   :  { %v1745_v50 = vpop.trf.xlu0 }
 0x5f3   :  { %v1818_v52 = vpop.trf.xlu1  ;;  %1836 = vst.msk [vmem:[%s4280_s9 + $0x50] sm:$0xff] %vm1825_vm3, %v1745_v50 }
 0x5f4   :  { %1851 = vst.msk [vmem:[%s4280_s9 + $0xc8] sm:$0xff] %vm1825_vm3, %v1818_v52 }
 0x5f6   :  { %v1746_v55 = vpop.trf.xlu0 }
 0x5f7   :  { %v1819_v31 = vpop.trf.xlu1  ;;  %1837 = vst.msk [vmem:[%s4280_s9 + $0x58] sm:$0xff] %vm1825_vm3, %v1746_v55 }
 0x5f8   :  { %1852 = vst.msk [vmem:[%s4280_s9 + $0xd0] sm:$0xff] %vm1825_vm3, %v1819_v31 }
 0x5fa   :  { %v1747_v53 = vpop.trf.xlu0 }
 0x5fb   :  { %v1820_v56 = vpop.trf.xlu1  ;;  %1838 = vst.msk [vmem:[%s4280_s9 + $0x60] sm:$0xff] %vm1825_vm3, %v1747_v53 }
 0x5fc   :  { %1853 = vst.msk [vmem:[%s4280_s9 + $0xd8] sm:$0xff] %vm1825_vm3, %v1820_v56 }
 0x5fe   :  { %v1748_v57 = vpop.trf.xlu0 }
 0x5ff   :  { %v1821_v60 = vpop.trf.xlu1  ;;  %1839 = vst.msk [vmem:[%s4280_s9 + $0x68] sm:$0xff] %vm1825_vm3, %v1748_v57 }
 0x600   :  { %1854 = vst.msk [vmem:[%s4280_s9 + $0xe0] sm:$0xff] %vm1825_vm3, %v1821_v60 }
 0x602   :  { %v1749_v18 = vpop.trf.xlu0 }
 0x603   :  { %v1822_v61 = vpop.trf.xlu1  ;;  %1840 = vst.msk [vmem:[%s4280_s9 + $0x70] sm:$0xff] %vm1825_vm3, %v1749_v18 }
 0x604   :  { %1855 = vst.msk [vmem:[%s4280_s9 + $0xe8] sm:$0xff] %vm1825_vm3, %v1822_v61 }
 0x606   :  { %v1750_v23 = vpop.trf.xlu0 }
 0x607   :  { %v1823_v29 = vpop.trf.xlu1  ;;  %1841 = vst.msk [vmem:[%s4280_s9 + $0x78] sm:$0xff] %vm1825_vm3, %v1750_v23 }
 0x608   :  { %1856 = vst.msk [vmem:[%s4280_s9 + $0xf0] sm:$0xff] %vm1825_vm3, %v1823_v29 }
 0x60b   :  { %v1824_v40 = vpop.trf.xlu1 }
 0x60c   :  { %1857 = vst.msk [vmem:[%s4280_s9 + $0xf8] sm:$0xff] %vm1825_vm3, %v1824_v40 }

</bundles_post_ra>
